<compile_context>
chip_gen: v7x
topology: tpu7x:2x2x1
jax: 0.10.0
libtpu: 0.0.40
codegen_flags: <defaults>
</compile_context>

<pallas_src>
import functools

import jax
import jax.numpy as jnp
from jax.experimental import pallas as pl
from jax.experimental.pallas import tpu as pltpu


def _round_up(x, m):
    return ((x + m - 1) // m) * m


# ---------------------------------------------------------------------------
# Fused kernel: conv (K-concat matmul) + mask + max-pool + bias/ReLU + FC
# ---------------------------------------------------------------------------
def _make_fused_cnn_kernel(filter_sizes, seq_len, l_pad):
    filter_sizes = tuple(int(fs) for fs in filter_sizes)

    def kernel(x_ref, wconv_ref, bconv_ref, wfc_ref, bfc_ref, o_ref):
        # x_ref:     (TB, S_pad, E_pad)          zero-padded embeddings (bf16/f32)
        # wconv_ref: (sum(fs)*E_pad, F_pad)      per-fs stacked conv weights
        # bconv_ref: (n_fs, F_pad)               conv biases (f32)
        # wfc_ref:   (n_fs, F_pad, O_pad)        per-fs blocks of FC weight (f32)
        # bfc_ref:   (1, O_pad)                  FC bias (f32)
        # o_ref:     (TB, O_pad)                 lane-dense output (f32)
        tb = x_ref.shape[0]
        e_pad = x_ref.shape[2]
        f_pad = bconv_ref.shape[1]

        x = x_ref[...]                                    # load tile once

        # Loop-invariant position index: (1, L, 1), broadcast inside where().
        pos = jax.lax.broadcasted_iota(jnp.int32, (1, l_pad, 1), 1)
        neg = jnp.float32(-1e30)

        fc_acc = None
        off = 0
        for i, fs in enumerate(filter_sizes):
            l_valid = seq_len - fs + 1                    # valid conv positions

            # Conv as ONE MXU matmul with K = fs * E_pad (K-concat, no im2col
            # over positions, no per-shift accumulator adds).
            xcat = jnp.concatenate(
                [x[:, j:j + l_pad, :] for j in range(fs)], axis=-1,
            ).reshape(tb * l_pad, fs * e_pad)
            wblk = wconv_ref[pl.ds(off * e_pad, fs * e_pad), :]   # (fs*E_pad, F_pad)
            acc = jnp.dot(xcat, wblk, preferred_element_type=jnp.float32)
            acc = acc.reshape(tb, l_pad, f_pad)
            off += fs

            # Mask invalid / padded positions with -inf-ish BEFORE the max
            # (bias/ReLU are hoisted after the max: max(relu(a+b))=relu(max(a)+b)).
            acc = jnp.where(pos < l_valid, acc, neg)
            pooled = jnp.max(acc, axis=1)                 # (TB, F_pad)  f32

            bias = bconv_ref[pl.ds(i, 1), :]              # (1, F_pad)
            pooled = jnp.maximum(pooled + bias, 0.0)      # bias + ReLU, f32

            # TODO(synk): training-mode dropout (stateful PRNG mask) not
            # implemented; inference mode => identity.

            # FC contribution: accumulate K=128 matmul against this fs's block
            # of the FC weight (kept in f32; avoids the lane-block concat).
            contrib = jnp.dot(pooled, wfc_ref[i],
                              preferred_element_type=jnp.float32)
            fc_acc = contrib if fc_acc is None else fc_acc + contrib

        o_ref[...] = (fc_acc + bfc_ref[...]).astype(o_ref.dtype)

    return kernel


# ---------------------------------------------------------------------------
# Full forward pass (mirrors CNN.forward)
# ---------------------------------------------------------------------------
def cnn_forward(text, params, filter_sizes, n_filters, output_dim,
                compute_dtype=jnp.bfloat16, batch_tile=128):
    # batch_tile: 128 is a good default on v5e/v7x; 256 on v6e for large batches.
    # It is clamped to the (8-rounded) real batch so small batches don't over-pad,
    # and the grid stays multi-step at real batch sizes (v7x has 2 TCs).
    #
    # text: int32 [seq_len, batch] -> permute(1, 0) -> [batch, seq_len]
    tokens = text.T
    B, S = tokens.shape
    emb_table = params["embedding"]
    emb_dim = emb_table.shape[1]
    n_fs = len(filter_sizes)
    max_fs = max(filter_sizes)
    if S < max_fs:
        raise ValueError("seq_len must be >= max(filter_sizes)")

    # Padded geometry: lane dims -> multiples of 128, sublane dims -> 8.
    tb = _round_up(min(batch_tile, _round_up(B, 8)), 8)
    b_pad = _round_up(max(B, tb), tb)
    l_pad = _round_up(S, 8)                       # conv-position tile
    s_pad = l_pad + _round_up(max_fs - 1, 8)      # headroom for shifted slices
    e_pad = _round_up(emb_dim, 128)
    f_pad = _round_up(n_filters, 128)
    o_pad = _round_up(output_dim, 128)
    total_j = sum(filter_sizes)

    # --- glue: embedding gather + zero padding, done directly in compute_dtype
    # (bf16 halves the dominant HBM traffic of the padded-x materialization) ---
    embedded = jnp.take(emb_table.astype(compute_dtype), tokens, axis=0)  # (B,S,E)
    x = jnp.zeros((b_pad, s_pad, e_pad), compute_dtype)
    x = x.at[:B, :S, :emb_dim].set(embedded)

    # --- glue: pack / zero-pad weights into kernel layout ---
    # PyTorch conv weight (F, 1, fs, E): W_j = weight[:, 0, j, :].T  (E, F),
    # stacked per shift along K so each filter size is one (fs*E_pad, F_pad) block.
    wconv = jnp.zeros((total_j, e_pad, f_pad), jnp.float32)
    bconv = jnp.zeros((n_fs, f_pad), jnp.float32)
    off = 0
    for i, fs in enumerate(filter_sizes):
        w4 = params[f"conv_w_{fs}"]
        for j in range(fs):
            wconv = wconv.at[off + j, :emb_dim, :n_filters].set(w4[:, 0, j, :].T)
        bconv = bconv.at[i, :n_filters].set(params[f"conv_b_{fs}"])
        off += fs
    wconv = wconv.reshape(total_j * e_pad, f_pad).astype(compute_dtype)

    # PyTorch fc weight (O, n_fs*F): re-block to padded per-filter-size slots.
    # Kept in f32 (the FC matmul is tiny and this avoids a downcast of pooled).
    wfc_t = params["fc_w"].T.reshape(n_fs, n_filters, output_dim)
    wfc = jnp.zeros((n_fs, f_pad, o_pad), jnp.float32)
    wfc = wfc.at[:, :n_filters, :output_dim].set(wfc_t)
    bfc = jnp.zeros((1, o_pad), jnp.float32).at[0, :output_dim].set(params["fc_b"])

    kernel = _make_fused_cnn_kernel(filter_sizes, S, l_pad)

    # TODO(synk): for very long sequences, additionally tile the seq axis with a
    # running-max accumulator; tweet-length sequences fit a batch tile in VMEM.
    out = pl.pallas_call(
        kernel,
        out_shape=jax.ShapeDtypeStruct((b_pad, o_pad), jnp.float32),
        grid=(b_pad // tb,),
        in_specs=[
            pl.BlockSpec((tb, s_pad, e_pad), lambda b: (b, 0, 0)),
            # Weights are grid-invariant (constant index_map -> re-fetch elided).
            pl.BlockSpec((total_j * e_pad, f_pad), lambda b: (0, 0)),
            pl.BlockSpec((n_fs, f_pad), lambda b: (0, 0)),
            pl.BlockSpec((n_fs, f_pad, o_pad), lambda b: (0, 0, 0)),
            pl.BlockSpec((1, o_pad), lambda b: (0, 0)),
        ],
        out_specs=pl.BlockSpec((tb, o_pad), lambda b: (b, 0)),
        compiler_params=pltpu.CompilerParams(
            dimension_semantics=("parallel",),
            # Headroom for tb=128+ f32 accumulators / K-concat slabs; capped at
            # v7x's 64 MiB physical VMEM (v5e default scoped is only 16 MiB).
            vmem_limit_bytes=64 * 1024 * 1024,
        ),
    )(x, wconv, bconv, wfc, bfc)

    return out[:B, :output_dim]


# ---------------------------------------------------------------------------
# Deterministic parameter construction (PyTorch-native layouts, CNN.__init__)
# ---------------------------------------------------------------------------
def make_params(key, vocab_size, embedding_dim, n_filters, filter_sizes, output_dim):
    keys = jax.random.split(key, 3 + 2 * len(filter_sizes))
    params = {
        "embedding": jax.random.normal(
            keys[0], (vocab_size, embedding_dim), jnp.float32) * 0.1
    }
    for i, fs in enumerate(filter_sizes):
        params[f"conv_w_{fs}"] = jax.random.normal(
            keys[1 + 2 * i], (n_filters, 1, fs, embedding_dim), jnp.float32) * 0.1
        params[f"conv_b_{fs}"] = jax.random.normal(
            keys[2 + 2 * i], (n_filters,), jnp.float32) * 0.1
    d_in = len(filter_sizes) * n_filters
    params["fc_w"] = jax.random.normal(
        keys[-2], (output_dim, d_in), jnp.float32) * 0.1
    params["fc_b"] = jax.random.normal(keys[-1], (output_dim,), jnp.float32) * 0.1
    return params


# Pure-JAX reference (mirrors the PyTorch forward) for a correctness check.
# `compute_dtype` rounds the embedding / conv weights the same way the kernel
# does, so the comparison isolates kernel error rather than bf16 quantization.
def cnn_forward_reference(text, params, filter_sizes, compute_dtype=jnp.float32):
    tokens = text.T
    B, S = tokens.shape
    emb_table = params["embedding"].astype(compute_dtype).astype(jnp.float32)
    emb = jnp.take(emb_table, tokens, axis=0)                 # (B, S, E)
    pooled = []
    for fs in filter_sizes:
        w = params[f"conv_w_{fs}"][:, 0].astype(compute_dtype).astype(jnp.float32)
        b = params[f"conv_b_{fs}"]
        L = S - fs + 1
        windows = jnp.stack([emb[:, t:t + fs, :] for t in range(L)], axis=1)
        y = jnp.einsum("blje,fje->blf", windows, w,
                       precision=jax.lax.Precision.HIGHEST) + b
        pooled.append(jnp.max(jnp.maximum(y, 0.0), axis=1))
    cat = jnp.concatenate(pooled, axis=1)
    return jnp.dot(cat, params["fc_w"].T,
                   precision=jax.lax.Precision.HIGHEST) + params["fc_b"]


if __name__ == "__main__":
    vocab_size = 50
    embedding_dim = 32
    n_filters = 8
    filter_sizes = (3, 4, 5)
    output_dim = 4
    seq_len = 8
    batch = 2

    key = jax.random.PRNGKey(0)
    k_params, k_text = jax.random.split(key)

    params = make_params(
        k_params, vocab_size, embedding_dim, n_filters, filter_sizes, output_dim)

    # text: [seq_len, batch] int token ids (torchtext sequential field layout)
    text = jax.random.randint(k_text, (seq_len, batch), 0, vocab_size, jnp.int32)

    fwd = jax.jit(
        cnn_forward,
        static_argnames=("filter_sizes", "n_filters", "output_dim",
                         "compute_dtype", "batch_tile"))
    out = fwd(text, params, filter_sizes, n_filters, output_dim)
    out = jax.block_until_ready(out)
    assert out.shape == (batch, output_dim), out.shape

    ref = cnn_forward_reference(text, params, filter_sizes,
                                compute_dtype=jnp.bfloat16)
    assert jnp.allclose(out, ref, rtol=1e-2, atol=1e-2), (out, ref)

    print("KERNEL_OK")
</pallas_src>

<mosaic_0001>
module attributes {stable_mosaic.version = 11 : i64} {
  func.func @kernel(%arg0: i32, %arg1: memref<8x16x128xbf16, #tpu.memory_space<vmem>>, %arg2: memref<1536x128xbf16, #tpu.memory_space<vmem>>, %arg3: memref<3x128xf32, #tpu.memory_space<vmem>>, %arg4: memref<3x128x128xf32, #tpu.memory_space<vmem>>, %arg5: memref<1x128xf32, #tpu.memory_space<vmem>>, %arg6: memref<8x128xf32, #tpu.memory_space<vmem>>) attributes {dimension_semantics = [#tpu.dimension_semantics<parallel>], iteration_bounds = array<i64: 1>, scalar_prefetch = 0 : i64, scratch_operands = 0 : i64, tpu.core_type = #tpu.core_type<tc>, window_params = [{transform_indices = @transform_0, window_bounds = array<i64: 8, 16, 128>}, {pipeline_mode = #tpu.pipeline_mode<synchronous>, transform_indices = @transform_1, window_bounds = array<i64: 1536, 128>}, {pipeline_mode = #tpu.pipeline_mode<synchronous>, transform_indices = @transform_2, window_bounds = array<i64: 3, 128>}, {pipeline_mode = #tpu.pipeline_mode<synchronous>, transform_indices = @transform_3, window_bounds = array<i64: 3, 128, 128>}, {pipeline_mode = #tpu.pipeline_mode<synchronous>, transform_indices = @transform_4, window_bounds = array<i64: 1, 128>}, {transform_indices = @transform_5, window_bounds = array<i64: 8, 128>}]} {
    %c0 = arith.constant 0 : index
    %c0_0 = arith.constant 0 : index
    %c0_1 = arith.constant 0 : index
    %0 = vector.load %arg1[%c0, %c0_0, %c0_1] : memref<8x16x128xbf16, #tpu.memory_space<vmem>>, vector<8x16x128xbf16>
    %1 = tpu.iota {dimensions = array<i32: 1>} : vector<1x8x1xi32>
    %2 = vector.extract_strided_slice %0 {offsets = [0, 0, 0], sizes = [8, 8, 128], strides = [1, 1, 1]} : vector<8x16x128xbf16> to vector<8x8x128xbf16>
    %3 = vector.extract_strided_slice %0 {offsets = [0, 1, 0], sizes = [8, 8, 128], strides = [1, 1, 1]} : vector<8x16x128xbf16> to vector<8x8x128xbf16>
    %4 = vector.extract_strided_slice %0 {offsets = [0, 2, 0], sizes = [8, 8, 128], strides = [1, 1, 1]} : vector<8x16x128xbf16> to vector<8x8x128xbf16>
    %5 = tpu.concatenate %2, %3, %4 in 2 : vector<8x8x128xbf16>, vector<8x8x128xbf16>, vector<8x8x128xbf16> -> vector<8x8x384xbf16>
    %6 = vector.shape_cast %5 : vector<8x8x384xbf16> to vector<64x384xbf16>
    %c0_2 = arith.constant 0 : index
    %c0_3 = arith.constant 0 : index
    %7 = vector.load %arg2[%c0_2, %c0_3] : memref<1536x128xbf16, #tpu.memory_space<vmem>>, vector<384x128xbf16>
    %cst = arith.constant dense<0.000000e+00> : vector<64x128xf32>
    %8 = tpu.matmul %6, %7, %cst {dimension_numbers = #tpu.dot_dimension_numbers<[1], [0], [0], [1], [0, 0, 1, 1], [], []>} : vector<64x384xbf16>, vector<384x128xbf16>, vector<64x128xf32> -> vector<64x128xf32>
    %9 = vector.shape_cast %8 : vector<64x128xf32> to vector<8x8x128xf32>
    %c6_i32 = arith.constant 6 : i32
    %10 = vector.broadcast %c6_i32 : i32 to vector<1x8x1xi32>
    %11 = arith.cmpi slt, %1, %10 : vector<1x8x1xi32>
    %cst_4 = arith.constant -1.000000e+30 : f32
    %12 = vector.shape_cast %11 : vector<1x8x1xi1> to vector<1x8x1xi1>
    %13 = vector.broadcast %12 : vector<1x8x1xi1> to vector<8x8x128xi1>
    %14 = vector.broadcast %cst_4 : f32 to vector<8x8x128xf32>
    %15 = arith.select %13, %9, %14 : vector<8x8x128xi1>, vector<8x8x128xf32>
    %cst_5 = arith.constant dense<0xFF800000> : vector<8x128xf32>
    %16 = vector.multi_reduction <maximumf>, %15, %cst_5 [1] : vector<8x8x128xf32> to vector<8x128xf32>
    %c0_6 = arith.constant 0 : index
    %c0_7 = arith.constant 0 : index
    %17 = vector.load %arg3[%c0_6, %c0_7] : memref<3x128xf32, #tpu.memory_space<vmem>>, vector<1x128xf32>
    %18 = vector.broadcast %17 : vector<1x128xf32> to vector<8x128xf32>
    %19 = arith.addf %16, %18 : vector<8x128xf32>
    %cst_8 = arith.constant 0.000000e+00 : f32
    %20 = vector.broadcast %cst_8 : f32 to vector<8x128xf32>
    %21 = arith.maximumf %19, %20 : vector<8x128xf32>
    %c0_9 = arith.constant 0 : index
    %c0_10 = arith.constant 0 : index
    %c0_11 = arith.constant 0 : index
    %22 = vector.load %arg4[%c0_9, %c0_10, %c0_11] : memref<3x128x128xf32, #tpu.memory_space<vmem>>, vector<1x128x128xf32>
    %23 = vector.shape_cast %22 : vector<1x128x128xf32> to vector<128x128xf32>
    %cst_12 = arith.constant dense<0.000000e+00> : vector<8x128xf32>
    %24 = tpu.matmul %21, %23, %cst_12 {dimension_numbers = #tpu.dot_dimension_numbers<[1], [0], [0], [1], [0, 0, 1, 1], [], []>} : vector<8x128xf32>, vector<128x128xf32>, vector<8x128xf32> -> vector<8x128xf32>
    %25 = vector.extract_strided_slice %0 {offsets = [0, 0, 0], sizes = [8, 8, 128], strides = [1, 1, 1]} : vector<8x16x128xbf16> to vector<8x8x128xbf16>
    %26 = vector.extract_strided_slice %0 {offsets = [0, 1, 0], sizes = [8, 8, 128], strides = [1, 1, 1]} : vector<8x16x128xbf16> to vector<8x8x128xbf16>
    %27 = vector.extract_strided_slice %0 {offsets = [0, 2, 0], sizes = [8, 8, 128], strides = [1, 1, 1]} : vector<8x16x128xbf16> to vector<8x8x128xbf16>
    %28 = vector.extract_strided_slice %0 {offsets = [0, 3, 0], sizes = [8, 8, 128], strides = [1, 1, 1]} : vector<8x16x128xbf16> to vector<8x8x128xbf16>
    %29 = tpu.concatenate %25, %26, %27, %28 in 2 : vector<8x8x128xbf16>, vector<8x8x128xbf16>, vector<8x8x128xbf16>, vector<8x8x128xbf16> -> vector<8x8x512xbf16>
    %30 = vector.shape_cast %29 : vector<8x8x512xbf16> to vector<64x512xbf16>
    %c384 = arith.constant 384 : index
    %c0_13 = arith.constant 0 : index
    %31 = vector.load %arg2[%c384, %c0_13] : memref<1536x128xbf16, #tpu.memory_space<vmem>>, vector<512x128xbf16>
    %cst_14 = arith.constant dense<0.000000e+00> : vector<64x128xf32>
    %32 = tpu.matmul %30, %31, %cst_14 {dimension_numbers = #tpu.dot_dimension_numbers<[1], [0], [0], [1], [0, 0, 1, 1], [], []>} : vector<64x512xbf16>, vector<512x128xbf16>, vector<64x128xf32> -> vector<64x128xf32>
    %33 = vector.shape_cast %32 : vector<64x128xf32> to vector<8x8x128xf32>
    %c5_i32 = arith.constant 5 : i32
    %34 = vector.broadcast %c5_i32 : i32 to vector<1x8x1xi32>
    %35 = arith.cmpi slt, %1, %34 : vector<1x8x1xi32>
    %cst_15 = arith.constant -1.000000e+30 : f32
    %36 = vector.shape_cast %35 : vector<1x8x1xi1> to vector<1x8x1xi1>
    %37 = vector.broadcast %36 : vector<1x8x1xi1> to vector<8x8x128xi1>
    %38 = vector.broadcast %cst_15 : f32 to vector<8x8x128xf32>
    %39 = arith.select %37, %33, %38 : vector<8x8x128xi1>, vector<8x8x128xf32>
    %cst_16 = arith.constant dense<0xFF800000> : vector<8x128xf32>
    %40 = vector.multi_reduction <maximumf>, %39, %cst_16 [1] : vector<8x8x128xf32> to vector<8x128xf32>
    %c1 = arith.constant 1 : index
    %c0_17 = arith.constant 0 : index
    %41 = vector.load %arg3[%c1, %c0_17] : memref<3x128xf32, #tpu.memory_space<vmem>>, vector<1x128xf32>
    %42 = vector.broadcast %41 : vector<1x128xf32> to vector<8x128xf32>
    %43 = arith.addf %40, %42 : vector<8x128xf32>
    %cst_18 = arith.constant 0.000000e+00 : f32
    %44 = vector.broadcast %cst_18 : f32 to vector<8x128xf32>
    %45 = arith.maximumf %43, %44 : vector<8x128xf32>
    %c1_19 = arith.constant 1 : index
    %c0_20 = arith.constant 0 : index
    %c0_21 = arith.constant 0 : index
    %46 = vector.load %arg4[%c1_19, %c0_20, %c0_21] : memref<3x128x128xf32, #tpu.memory_space<vmem>>, vector<1x128x128xf32>
    %47 = vector.shape_cast %46 : vector<1x128x128xf32> to vector<128x128xf32>
    %cst_22 = arith.constant dense<0.000000e+00> : vector<8x128xf32>
    %48 = tpu.matmul %45, %47, %cst_22 {dimension_numbers = #tpu.dot_dimension_numbers<[1], [0], [0], [1], [0, 0, 1, 1], [], []>} : vector<8x128xf32>, vector<128x128xf32>, vector<8x128xf32> -> vector<8x128xf32>
    %49 = arith.addf %24, %48 : vector<8x128xf32>
    %50 = vector.extract_strided_slice %0 {offsets = [0, 0, 0], sizes = [8, 8, 128], strides = [1, 1, 1]} : vector<8x16x128xbf16> to vector<8x8x128xbf16>
    %51 = vector.extract_strided_slice %0 {offsets = [0, 1, 0], sizes = [8, 8, 128], strides = [1, 1, 1]} : vector<8x16x128xbf16> to vector<8x8x128xbf16>
    %52 = vector.extract_strided_slice %0 {offsets = [0, 2, 0], sizes = [8, 8, 128], strides = [1, 1, 1]} : vector<8x16x128xbf16> to vector<8x8x128xbf16>
    %53 = vector.extract_strided_slice %0 {offsets = [0, 3, 0], sizes = [8, 8, 128], strides = [1, 1, 1]} : vector<8x16x128xbf16> to vector<8x8x128xbf16>
    %54 = vector.extract_strided_slice %0 {offsets = [0, 4, 0], sizes = [8, 8, 128], strides = [1, 1, 1]} : vector<8x16x128xbf16> to vector<8x8x128xbf16>
    %55 = tpu.concatenate %50, %51, %52, %53, %54 in 2 : vector<8x8x128xbf16>, vector<8x8x128xbf16>, vector<8x8x128xbf16>, vector<8x8x128xbf16>, vector<8x8x128xbf16> -> vector<8x8x640xbf16>
    %56 = vector.shape_cast %55 : vector<8x8x640xbf16> to vector<64x640xbf16>
    %c896 = arith.constant 896 : index
    %c0_23 = arith.constant 0 : index
    %57 = vector.load %arg2[%c896, %c0_23] : memref<1536x128xbf16, #tpu.memory_space<vmem>>, vector<640x128xbf16>
    %cst_24 = arith.constant dense<0.000000e+00> : vector<64x128xf32>
    %58 = tpu.matmul %56, %57, %cst_24 {dimension_numbers = #tpu.dot_dimension_numbers<[1], [0], [0], [1], [0, 0, 1, 1], [], []>} : vector<64x640xbf16>, vector<640x128xbf16>, vector<64x128xf32> -> vector<64x128xf32>
    %59 = vector.shape_cast %58 : vector<64x128xf32> to vector<8x8x128xf32>
    %c4_i32 = arith.constant 4 : i32
    %60 = vector.broadcast %c4_i32 : i32 to vector<1x8x1xi32>
    %61 = arith.cmpi slt, %1, %60 : vector<1x8x1xi32>
    %cst_25 = arith.constant -1.000000e+30 : f32
    %62 = vector.shape_cast %61 : vector<1x8x1xi1> to vector<1x8x1xi1>
    %63 = vector.broadcast %62 : vector<1x8x1xi1> to vector<8x8x128xi1>
    %64 = vector.broadcast %cst_25 : f32 to vector<8x8x128xf32>
    %65 = arith.select %63, %59, %64 : vector<8x8x128xi1>, vector<8x8x128xf32>
    %cst_26 = arith.constant dense<0xFF800000> : vector<8x128xf32>
    %66 = vector.multi_reduction <maximumf>, %65, %cst_26 [1] : vector<8x8x128xf32> to vector<8x128xf32>
    %c2 = arith.constant 2 : index
    %c0_27 = arith.constant 0 : index
    %67 = vector.load %arg3[%c2, %c0_27] : memref<3x128xf32, #tpu.memory_space<vmem>>, vector<1x128xf32>
    %68 = vector.broadcast %67 : vector<1x128xf32> to vector<8x128xf32>
    %69 = arith.addf %66, %68 : vector<8x128xf32>
    %cst_28 = arith.constant 0.000000e+00 : f32
    %70 = vector.broadcast %cst_28 : f32 to vector<8x128xf32>
    %71 = arith.maximumf %69, %70 : vector<8x128xf32>
    %c2_29 = arith.constant 2 : index
    %c0_30 = arith.constant 0 : index
    %c0_31 = arith.constant 0 : index
    %72 = vector.load %arg4[%c2_29, %c0_30, %c0_31] : memref<3x128x128xf32, #tpu.memory_space<vmem>>, vector<1x128x128xf32>
    %73 = vector.shape_cast %72 : vector<1x128x128xf32> to vector<128x128xf32>
    %cst_32 = arith.constant dense<0.000000e+00> : vector<8x128xf32>
    %74 = tpu.matmul %71, %73, %cst_32 {dimension_numbers = #tpu.dot_dimension_numbers<[1], [0], [0], [1], [0, 0, 1, 1], [], []>} : vector<8x128xf32>, vector<128x128xf32>, vector<8x128xf32> -> vector<8x128xf32>
    %75 = arith.addf %49, %74 : vector<8x128xf32>
    %c0_33 = arith.constant 0 : index
    %c0_34 = arith.constant 0 : index
    %76 = vector.load %arg5[%c0_33, %c0_34] : memref<1x128xf32, #tpu.memory_space<vmem>>, vector<1x128xf32>
    %77 = vector.broadcast %76 : vector<1x128xf32> to vector<8x128xf32>
    %78 = arith.addf %75, %77 : vector<8x128xf32>
    %c0_35 = arith.constant 0 : index
    %c0_36 = arith.constant 0 : index
    %79 = vector.load %arg6[%c0_35, %c0_36] : memref<8x128xf32, #tpu.memory_space<vmem>>, vector<8x128xf32>
    tpu.vector_store %arg6[%c0_35, %c0_36], %78 {strides = array<i32>} : memref<8x128xf32, #tpu.memory_space<vmem>>, vector<8x128xf32>,
    return
  }
  func.func @transform_0(%arg0: i32) -> (i32, i32, i32) {
    %c0_i32 = arith.constant 0 : i32
    %c0_i32_0 = arith.constant 0 : i32
    %c0_i32_1 = arith.constant 0 : i32
    return %arg0, %c0_i32, %c0_i32_0 : i32, i32, i32
  }
  func.func @transform_1(%arg0: i32) -> (i32, i32) {
    %c0_i32 = arith.constant 0 : i32
    %c0_i32_0 = arith.constant 0 : i32
    %c0_i32_1 = arith.constant 0 : i32
    return %c0_i32, %c0_i32_0 : i32, i32
  }
  func.func @transform_2(%arg0: i32) -> (i32, i32) {
    %c0_i32 = arith.constant 0 : i32
    %c0_i32_0 = arith.constant 0 : i32
    %c0_i32_1 = arith.constant 0 : i32
    return %c0_i32, %c0_i32_0 : i32, i32
  }
  func.func @transform_3(%arg0: i32) -> (i32, i32, i32) {
    %c0_i32 = arith.constant 0 : i32
    %c0_i32_0 = arith.constant 0 : i32
    %c0_i32_1 = arith.constant 0 : i32
    %c0_i32_2 = arith.constant 0 : i32
    return %c0_i32, %c0_i32_0, %c0_i32_1 : i32, i32, i32
  }
  func.func @transform_4(%arg0: i32) -> (i32, i32) {
    %c0_i32 = arith.constant 0 : i32
    %c0_i32_0 = arith.constant 0 : i32
    %c0_i32_1 = arith.constant 0 : i32
    return %c0_i32, %c0_i32_0 : i32, i32
  }
  func.func @transform_5(%arg0: i32) -> (i32, i32) {
    %c0_i32 = arith.constant 0 : i32
    %c0_i32_0 = arith.constant 0 : i32
    return %arg0, %c0_i32 : i32, i32
  }
}

</mosaic_0001>

<bundles_post_ra>
// kernel: cnn_forward.1
= control target key start
LH: loop header
LB: loop body
LE: loop exit
PB: predicated region body
PF: predicated region fallthrough
CT: control target
= control target key end

     0   :  { %10 = vsyncpa [#allocation3], 0  ;;  %s3441_s0 = inlined_call_operand.hbm [shape: bf16[8,16,128], index: 0, kind: input, shape index: {}]   ;;  %s3442_s1 = inlined_call_operand.hbm [shape: bf16[1536,128], index: 1, kind: input, shape index: {}]   ;;  %s3443_s2 = inlined_call_operand.hbm [shape: f32[3,128], index: 2, kind: input, shape index: {}]   ;;  %s3444_s3 = inlined_call_operand.hbm [shape: f32[3,128,128], index: 3, kind: input, shape index: {}]   ;;  %s3445_s4 = inlined_call_operand.hbm [shape: f32[1,128], index: 4, kind: input, shape index: {}]   ;;  %s3446_s5 = inlined_call_operand.hbm [shape: f32[8,128], index: 5, kind: output, shape index: {}]  }
   0x1   :  { %11 = vsyncpa [#allocation6], 0 }
   0x2   :  { %12 = vsyncpa [#allocation9], 0 }
   0x3   :  { %13 = vsyncpa [#allocation4], 0  ;;  %s3027_s18 = smov [#allocation5]   ;;  %s3028_s20 = smov [#allocation8]  }
   0x4   :  { %s31_s19 = sshll.u32 %s3027_s18, 4  ;;  %s53_s21 = sshll.u32 %s3028_s20, 4  ;;  %s32_s19 = int_to_ptr.vmem [resolvable:$true] %s31_s19  ;;  %s3070_s21 = int_to_ptr.vmem [resolvable:$true] %s53_s21 }
   0x5   :  { %s2887_s24 = scalar_lea.hbm %s3442_s1, 12288 }
   0x6   :  { %p2888_p0 = scmp.ne.s32.totalorder %s3442_s1, %s2887_s24  ;;  %p2891_p1 = scmp.lt.u32.totalorder %s2887_s24, %s3442_s1 }
   0x8   :  { %p2893_p2 = pnand %p2891_p1, %p2888_p0 }
   0xa   :  { %2896 = shalt.err (!%p2893_p2)
}
   0xb   :  { %s2897_s29 = scalar_lea.vmem %s32_s19, 12288  ;;  %p2902_p4 = scmp.lt.s32.totalorder %s32_s19, %s32_s19 }
   0xc   :  { %p2898_p3 = scmp.ne.s32.totalorder %s32_s19, %s2897_s29  ;;  %p2903_p5 = scmp.lt.s32.totalorder %s2897_s29, %s2897_s29 }
   0xe   :  { %p2904_p6 = por %p2903_p5, %p2902_p4 }
  0x10   :  { %p2905_p7 = pnand %p2904_p6, %p2898_p3 }
  0x12   :  { %2908 = shalt.err (!%p2905_p7)
}
  0x13   :  { %s3029_s30 = smov 64   ;;  %s3030_s6 = smov 4  }
  0x14   :  { %37 = dma.hbm_to_vmem [thread:$0]  %s3442_s1, 12288, %s32_s19, [#allocation6], %s3029_s30, %s3029_s30, %s3030_s6  }
  0x15   :  { %s2909_s11 = scalar_lea.hbm %s3444_s3, 6144 }
  0x16   :  { %p2910_p8 = scmp.ne.s32.totalorder %s3444_s3, %s2909_s11  ;;  %p2913_p9 = scmp.lt.u32.totalorder %s2909_s11, %s3444_s3 }
  0x18   :  { %p2915_p10 = pnand %p2913_p9, %p2910_p8 }
  0x1a   :  { %2918 = shalt.err (!%p2915_p10)
}
  0x1b   :  { %s2919_s16 = scalar_lea.vmem %s3070_s21, 6144  ;;  %p2924_p12 = scmp.lt.s32.totalorder %s3070_s21, %s3070_s21 }
  0x1c   :  { %p2920_p11 = scmp.ne.s32.totalorder %s3070_s21, %s2919_s16  ;;  %p2925_p13 = scmp.lt.s32.totalorder %s2919_s16, %s2919_s16 }
  0x1e   :  { %p2926_p0 = por %p2925_p13, %p2924_p12 }
  0x20   :  { %p2927_p1 = pnand %p2926_p0, %p2920_p11 }
  0x22   :  { %2930 = shalt.err (!%p2927_p1)
}
  0x23   :  { %s3031_s1 = smov 128   ;;  %s3032_s17 = smov 8  }
  0x24   :  { %59 = dma.hbm_to_vmem [thread:$0]  %s3444_s3, 6144, %s3070_s21, [#allocation9], %s3031_s1, %s3031_s1, %s3032_s17  }
  0x25   :  { %s3033_s20 = smov [#allocation2]   ;;  %s3034_s23 = smov [#allocation7]  }
  0x26   :  { %s19_s22 = sshll.u32 %s3033_s20, 4  ;;  %s44_s24 = sshll.u32 %s3034_s23, 4  ;;  %s20_s22 = int_to_ptr.vmem [resolvable:$true] %s19_s22  ;;  %s45_s24 = int_to_ptr.vmem [resolvable:$true] %s44_s24 }
  0x27   :  { %s2931_s27 = scalar_lea.hbm %s3441_s0, 1024 }
  0x28   :  { %p2932_p2 = scmp.ne.s32.totalorder %s3441_s0, %s2931_s27  ;;  %p2935_p3 = scmp.lt.u32.totalorder %s2931_s27, %s3441_s0 }
  0x2a   :  { %p2937_p4 = pnand %p2935_p3, %p2932_p2 }
  0x2c   :  { %2940 = shalt.err (!%p2937_p4)
}
  0x2d   :  { %s2941_s3 = scalar_lea.vmem %s20_s22, 1024  ;;  %p2946_p6 = scmp.lt.s32.totalorder %s20_s22, %s20_s22 }
  0x2e   :  { %p2942_p5 = scmp.ne.s32.totalorder %s20_s22, %s2941_s3  ;;  %p2947_p7 = scmp.lt.s32.totalorder %s2941_s3, %s2941_s3 }
  0x30   :  { %p2948_p8 = por %p2947_p7, %p2946_p6 }
  0x32   :  { %p2949_p9 = pnand %p2948_p8, %p2942_p5 }
  0x34   :  { %2952 = shalt.err (!%p2949_p9)
}
  0x35   :  { %25 = dma.hbm_to_vmem [thread:$0]  %s3441_s0, 1024, %s20_s22, [#allocation3], %s3029_s30, %s3029_s30, %s3030_s6  }
  0x36   :  { %s2953_s12 = scalar_lea.hbm %s3443_s2, 64 }
  0x37   :  { %p2954_p10 = scmp.ne.s32.totalorder %s3443_s2, %s2953_s12  ;;  %p2957_p11 = scmp.lt.u32.totalorder %s2953_s12, %s3443_s2 }
  0x39   :  { %p2959_p12 = pnand %p2957_p11, %p2954_p10 }
  0x3b   :  { %2962 = shalt.err (!%p2959_p12)
}
  0x3c   :  { %s2963_s1 = scalar_lea.vmem %s45_s24, 64  ;;  %p2968_p0 = scmp.lt.s32.totalorder %s45_s24, %s45_s24 }
  0x3d   :  { %p2964_p13 = scmp.ne.s32.totalorder %s45_s24, %s2963_s1  ;;  %p2969_p1 = scmp.lt.s32.totalorder %s2963_s1, %s2963_s1 }
  0x3f   :  { %p2970_p2 = por %p2969_p1, %p2968_p0 }
  0x41   :  { %p2971_p3 = pnand %p2970_p2, %p2964_p13 }
  0x43   :  { %2974 = shalt.err (!%p2971_p3)
}
  0x44   :  { %47 = dma.hbm_to_vmem [thread:$0]  %s3443_s2, 64, %s45_s24, [#allocation6]  }
  0x45   :  { %s3035_s6 = smov [#allocation10]   ;;  %s2975_s20 = scalar_lea.hbm %s3445_s4, 16 }
  0x46   :  { %s66_s17 = sshll.u32 %s3035_s6, 4  ;;  %p2976_p4 = scmp.ne.s32.totalorder %s3445_s4, %s2975_s20  ;;  %s67_s17 = int_to_ptr.vmem [resolvable:$true] %s66_s17 }
  0x47   :  { %p2979_p5 = scmp.lt.u32.totalorder %s2975_s20, %s3445_s4 }
  0x49   :  { %p2981_p6 = pnand %p2979_p5, %p2976_p4 }
  0x4b   :  { %2984 = shalt.err (!%p2981_p6)
}
  0x4c   :  { %s2985_s27 = scalar_lea.vmem %s67_s17, 16  ;;  %s2989_s2 = scalar_lea.vmem %s67_s17, 32 }
  0x4d   :  { %p2986_p7 = scmp.ne.s32.totalorder %s67_s17, %s2985_s27  ;;  %p2990_p8 = scmp.lt.s32.totalorder %s67_s17, %s67_s17 }
  0x4e   :  { %p2991_p9 = scmp.lt.s32.totalorder %s2989_s2, %s2985_s27 }
  0x50   :  { %p2992_p10 = por %p2991_p9, %p2990_p8 }
  0x52   :  { %p2993_p11 = pnand %p2992_p10, %p2986_p7 }
  0x54   :  { %2996 = shalt.err (!%p2993_p11)
}
  0x55   :  { %69 = dma.hbm_to_vmem [thread:$0]  %s3445_s4, 16, %s67_s17, [#allocation9]  }
  0x56   :  { %3019 = dma.done.wait [#allocation3], 1024  }
  0x57   :  { %3020 = vsyncadd [#allocation3], 4294966272 }
  0x58   :  { %3021 = dma.done.wait [#allocation6], 12352  }
  0x59   :  { %3022 = vsyncadd [#allocation6], 4294954944 }
  0x5a   :  { %3023 = dma.done.wait [#allocation9], 6160  }
  0x5b   :  { %3024 = vsyncadd [#allocation9], 4294961136  ;;  %v2779_v0 = vld [vmem:[#allocation5 + $0x40] sm:$0xff]   ;;  %v2782_v3 = vld [vmem:[#allocation5 + $0x48] sm:$0xff]   ;;  %vm3037_vm0 = vmmov 0   ;;  %vm1198_vm2 = vcmask 1041409  }
  0x5c   :  { %v2780_v1 = vld [vmem:[#allocation5 + $0x80] sm:$0xff]   ;;  %2266 = vmatprep.subr.bf16.mxu0 %v2779_v0  ;;  %v2783_v4 = vld [vmem:[#allocation5 + $0x88] sm:$0xff]   ;;  %v2785_v6 = vld [vmem:[#allocation5 + $0x50] sm:$0xff]   ;;  %vm1201_vm3 = vcmask 1042434   ;;  %vm1204_vm4 = vcmask 1043459   ;;  %vm1207_vm6 = vcmask 1044484  }
  0x5d   :  { %v2781_v2 = vld [vmem:[#allocation5] sm:$0xff]   ;;  %2541 = vmatprep.subr.bf16.mxu1 %v2780_v1  ;;  %v2784_v5 = vld [vmem:[#allocation5 + $0x8] sm:$0xff]   ;;  %v2786_v7 = vld [vmem:[#allocation5 + $0x90] sm:$0xff]   ;;  %vm1210_vm7 = vcmask 1045509   ;;  %vm1213_vm8 = vcmask 1046534   ;;  %vm1216_vm9 = vcmask 1047559  }
  0x5e   :  { %2267 = vmatpush3.bf16.msra.mxu0 %v2781_v2  ;;  %2542 = vmatpush3.bf16.msra.mxu1 %v2780_v1  ;;  %v2787_v8 = vld [vmem:[#allocation5 + $0x10] sm:$0xff]   ;;  %v2788_v9 = vld [vmem:[#allocation5 + $0x58] sm:$0xff]   ;;  %v2791_v12 = vld [vmem:[#allocation5 + $0x60] sm:$0xff]   ;;  %s3039_s4 = smov [#allocation11]  }
  0x5f   :  { %2268 = vmatprep.subr.bf16.mxu0 %v2782_v3  ;;  %2543 = vmatprep.subr.bf16.mxu1 %v2783_v4  ;;  %v2789_v10 = vld [vmem:[#allocation5 + $0x98] sm:$0xff]   ;;  %v2792_v13 = vld [vmem:[#allocation5 + $0xa0] sm:$0xff]   ;;  %v2794_v15 = vld [vmem:[#allocation5 + $0x68] sm:$0xff]   ;;  %s2127_s29 = sshll.u32 %s3039_s4, 4  ;;  %s2128_s29 = int_to_ptr.vmem [resolvable:$true] %s2127_s29 }
  0x60   :  { %v2790_v11 = vld [vmem:[#allocation5 + $0x18] sm:$0xff]   ;;  %v2793_v14 = vld [vmem:[#allocation5 + $0x20] sm:$0xff]   ;;  %v2795_v16 = vld [vmem:[#allocation5 + $0xa8] sm:$0xff]   ;;  %s2997_s7 = scalar_lea.vmem %s2128_s29, 128  ;;  %p3002_p13 = scmp.lt.s32.totalorder %s2128_s29, %s2128_s29 }
  0x61   :  { %v2796_v17 = vld [vmem:[#allocation5 + $0x28] sm:$0xff]   ;;  %v2797_v18 = vld [vmem:[#allocation5 + $0x70] sm:$0xff]   ;;  %v2800_v21 = vld [vmem:[#allocation5 + $0x78] sm:$0xff]   ;;  %p2998_p12 = scmp.ne.s32.totalorder %s2128_s29, %s2997_s7  ;;  %p3003_p0 = scmp.lt.s32.totalorder %s2997_s7, %s2997_s7 }
  0x62   :  { %2269 = vmatpush3.bf16.msra.mxu0 %v2784_v5  ;;  %2544 = vmatpush3.bf16.msra.mxu1 %v2783_v4  ;;  %v2798_v19 = vld [vmem:[#allocation5 + $0xb0] sm:$0xff]   ;;  %v2801_v22 = vld [vmem:[#allocation5 + $0xb8] sm:$0xff]   ;;  %v86_v23 = vld [vmem:[#allocation2] sm:$0xf] }
  0x63   :  { %2270 = vmatprep.subr.bf16.mxu0 %v2785_v6  ;;  %2545 = vmatprep.subr.bf16.mxu1 %v2786_v7  ;;  %v2799_v20 = vld [vmem:[#allocation5 + $0x30] sm:$0xff]   ;;  %v87_v24 = vld [vmem:[#allocation2 + $0x4] sm:$0xf]  ;;  %v88_v25 = vld [vmem:[#allocation2 + $0x8] sm:$0xf]  ;;  %p3004_p1 = por %p3003_p0, %p3002_p13 }
  0x64   :  { %v89_v26 = vld [vmem:[#allocation2 + $0xc] sm:$0xf]  ;;  %v3143_v27 = vcombine.low %v86_v23, %v87_v24  ;;  %v3145_v28 = vld [vmem:[#allocation2 + $0x10] sm:$0xf]  ;;  %v91_v29 = vld [vmem:[#allocation2 + $0x14] sm:$0xf]  ;;  %v3168_v55 = vcombine.low %v86_v23, %v88_v25 }
  0x65   :  { %v3147_v30 = vcombine.low %v88_v25, %v89_v26  ;;  %v92_v31 = vld [vmem:[#allocation2 + $0x18] sm:$0xf]  ;;  %v93_v32 = vld [vmem:[#allocation2 + $0x1c] sm:$0xf]  ;;  %v3150_v33 = vcombine.low %v3145_v28, %v91_v29  ;;  %v2808_v45 = vld [vmem:[#allocation5 + $0x100] sm:$0xff]   ;;  %p3005_p2 = pnand %p3004_p1, %p2998_p12 }
  0x66   :  { %2271 = vmatpush3.bf16.msra.mxu0 %v2787_v8  ;;  %2546 = vmatpush3.bf16.msra.mxu1 %v2786_v7  ;;  %v2802_v34 = vld [vmem:[#allocation5 + $0x38] sm:$0xff]   ;;  %v145_v35 = vshrl.u32 %v3143_v27, 16  ;;  %v147_v36 = vshll.u32 %v3143_v27, 16  ;;  %v200_v37 = vrot.slane %v3143_v27, 1  ;;  %v3155_v38 = vcombine.low %v92_v31, %v93_v32  ;;  %v2809_v48 = vld [vmem:[#allocation5 + $0x180] sm:$0xff]   ;;  %v2813_v56 = vld [vmem:[#allocation5 + $0x188] sm:$0xff]  }
  0x67   :  { %2272 = vmatprep.subr.bf16.mxu0 %v2788_v9  ;;  %2547 = vmatprep.subr.bf16.mxu1 %v2789_v10  ;;  %v152_v39 = vshrl.u32 %v3147_v30, 16  ;;  %v154_v40 = vshll.u32 %v3147_v30, 16  ;;  %v201_v41 = vrot.slane %v3147_v30, 1  ;;  %v202_v42 = vrot.slane %v3150_v33, 1  ;;  %v2810_v52 = vld [vmem:[#allocation5 + $0xc0] sm:$0xff]   ;;  %v2812_v59 = vld [vmem:[#allocation5 + $0x108] sm:$0xff]  }
  0x68   :  { %v149_v43 = vrot.slane %v147_v36, 1  ;;  %v203_v44 = vrot.slane %v3155_v38, 1  ;;  %v2811_v53 = vld [vmem:[#allocation5 + $0x140] sm:$0xff]   ;;  %v159_v54 = vshrl.u32 %v3150_v33, 16  ;;  %v161_v57 = vshll.u32 %v3150_v33, 16  ;;  %v2815_v60 = vld [vmem:[#allocation5 + $0x148] sm:$0xff]  }
  0x69   :  { %v156_v46 = vrot.slane %v154_v40, 1  ;;  %v3162_v47 = vcombine.low %v200_v37, %v201_v41  ;;  %v166_v62 = vshrl.u32 %v3155_v38, 16  ;;  %v168_v63 = vshll.u32 %v3155_v38, 16  ;;  %v2818_v2 = vld [vmem:[#allocation5 + $0x190] sm:$0xff]   ;;  %v2814_v3 = vld [vmem:[#allocation5 + $0xc8] sm:$0xff]   ;;  %v2828_v26 = vld [vmem:[#allocation5 + $0x120] sm:$0xff]  }
  0x6a   :  { %2273 = vmatpush3.bf16.msra.mxu0 %v2790_v11  ;;  %2548 = vmatpush3.bf16.msra.mxu1 %v2789_v10  ;;  %v150_v49 = vor.u32 %v149_v43, %v145_v35  ;;  %v3164_v50 = vcombine.low %v202_v42, %v203_v44  ;;  %v163_v61 = vrot.slane %v161_v57, 1  ;;  %v2817_v5 = vld [vmem:[#allocation5 + $0x110] sm:$0xff]   ;;  %v3178_v6 = vrot.slane %v145_v35, 1  ;;  %v97_v23 = vld [vmem:[#allocation2 + $0x2c] sm:$0xf]  ;;  %v2829_v29 = vld [vmem:[#allocation5 + $0x1a0] sm:$0xff]  }
  0x6b   :  { %2274 = vmatprep.subr.bf16.mxu0 %v2791_v12  ;;  %2549 = vmatprep.subr.bf16.mxu1 %v2792_v13  ;;  %v157_v51 = vor.u32 %v156_v46, %v152_v39  ;;  %v170_v1 = vrot.slane %v168_v63, 1  ;;  %v2819_v7 = vld [vmem:[#allocation5 + $0xd0] sm:$0xff]   ;;  %v3180_v9 = vrot.slane %v147_v36, 2  ;;  %v3185_v11 = vcombine.low %v3145_v28, %v92_v31  ;;  %v2821_v12 = vld [vmem:[#allocation5 + $0x118] sm:$0xff]   ;;  %v2831_v41 = vld [vmem:[#allocation5 + $0x160] sm:$0xff]  }
  0x6c   :  { %2557 = vmatprep.mubr.bf16.mxu1 %v3162_v47  ;;  %v164_v0 = vor.u32 %v163_v61, %v159_v54  ;;  %v2820_v8 = vld [vmem:[#allocation5 + $0x150] sm:$0xff]   ;;  %v3201_v28 = vrot.slane %v166_v62, 1  ;;  %v3203_v31 = vrot.slane %v168_v63, 2 }
  0x6d   :  { %v3171_v58 = vcombine.low %v150_v49, %v157_v51  ;;  %v171_v4 = vor.u32 %v170_v1, %v166_v62  ;;  %v99_v46 = vld [vmem:[#allocation2 + $0x34] sm:$0xf] }
  0x6e   :  { %2275 = vmatpush3.bf16.msra.mxu0 %v2793_v14  ;;  %2550 = vmatpush3.bf16.msra.mxu1 %v2792_v13  ;;  %v2822_v13 = vld [vmem:[#allocation5 + $0x198] sm:$0xff]   ;;  %v3187_v14 = vrot.slane %v152_v39, 1 }
  0x6f   :  { %2276 = vmatprep.subr.bf16.mxu0 %v2794_v15  ;;  %2551 = vmatprep.subr.bf16.mxu1 %v2795_v16  ;;  %v3182_v10 = vcombine.low %v164_v0, %v171_v4  ;;  %v3189_v15 = vrot.slane %v154_v40, 2  ;;  %v2830_v40 = vld [vmem:[#allocation5 + $0xe0] sm:$0xff]   ;;  %v2835_v0 = vld [vmem:[#allocation5 + $0x1a8] sm:$0xff]  }
  0x70   :  { %472 = vmatprep.mubr.bf16.mxu0 %v3171_v58 }
  0x72   :  { %2277 = vmatpush3.bf16.msra.mxu0 %v2796_v17  ;;  %2552 = vmatpush3.bf16.msra.mxu1 %v2795_v16  ;;  %v3191_v16 = vrot.slane %v159_v54, 1  ;;  %v2824_v17 = vld [vmem:[#allocation5 + $0x158] sm:$0xff]   ;;  %v668_v54 = vor.u32 %v3180_v9, %v3178_v6 }
  0x73   :  { %2278 = vmatprep.subr.bf16.mxu0 %v2797_v18  ;;  %2553 = vmatprep.subr.bf16.mxu1 %v2798_v19  ;;  %v94_v18 = vld [vmem:[#allocation2 + $0x20] sm:$0xf] }
  0x76   :  { %2279 = vmatpush3.bf16.msra.mxu0 %v2799_v20  ;;  %2554 = vmatpush3.bf16.msra.mxu1 %v2798_v19  ;;  %v3194_v19 = vrot.slane %v161_v57, 2  ;;  %v2823_v20 = vld [vmem:[#allocation5 + $0xd8] sm:$0xff]  }
  0x77   :  { %2280 = vmatprep.subr.bf16.mxu0 %v2800_v21  ;;  %2555 = vmatprep.subr.bf16.mxu1 %v2801_v22  ;;  %v95_v21 = vld [vmem:[#allocation2 + $0x24] sm:$0xf] }
  0x78   :  { %v3197_v24 = vcombine.low %v94_v18, %v95_v21  ;;  %v2842_v21 = vld [vmem:[#allocation5 + $0x170] sm:$0xff]  }
  0x7a   :  { %2281 = vmatpush3.bf16.msra.mxu0 %v2802_v34  ;;  %2556 = vmatpush3.bf16.msra.mxu1 %v2801_v22  ;;  %v96_v22 = vld [vmem:[#allocation2 + $0x28] sm:$0xf]  ;;  %v173_v32 = vshrl.u32 %v3197_v24, 16  ;;  %v175_v34 = vshll.u32 %v3197_v24, 16  ;;  %v204_v37 = vrot.slane %v3197_v24, 1 }
  0x7b   :  { %2318 = vmatprep.subr.bf16.mxu0 %v2808_v45  ;;  %2358 = vmatprep.subr.bf16.mxu1 %v2809_v48  ;;  %v3199_v25 = vcombine.low %v96_v22, %v97_v23  ;;  %v98_v45 = vld [vmem:[#allocation2 + $0x30] sm:$0xf]  ;;  %v100_v48 = vld [vmem:[#allocation2 + $0x38] sm:$0xf] }
  0x7c   :  { %v177_v42 = vrot.slane %v175_v34, 1  ;;  %v3226_v61 = vrot.slane %v173_v32, 1  ;;  %v3243_v23 = vcombine.low %v98_v45, %v100_v48 }
  0x7d   :  { %2558 = vmatmul.mubr.bf16.vlgmr.msra.gmra.mrb[0].mxu1 %v3164_v50  ;;  %473 = vmatmul.mubr.bf16.vlgmr.msra.gmra.mrb[0].mxu0 %v3168_v55  ;;  %v180_v35 = vshrl.u32 %v3199_v25, 16  ;;  %v182_v36 = vshll.u32 %v3199_v25, 16  ;;  %v205_v39 = vrot.slane %v3199_v25, 1 }
  0x7e   :  { %2359 = vmatpush3.bf16.msra.mxu1 %v2811_v53  ;;  %2319 = vmatpush3.bf16.msra.mxu0 %v2810_v52  ;;  %v178_v49 = vor.u32 %v177_v42, %v173_v32  ;;  %v101_v52 = vld [vmem:[#allocation2 + $0x3c] sm:$0xf]  ;;  %v3215_v53 = vcombine.low %v98_v45, %v99_v46 }
  0x7f   :  { %2360 = vmatprep.subr.bf16.mxu1 %v2813_v56  ;;  %2320 = vmatprep.subr.bf16.mxu0 %v2812_v59  ;;  %v184_v43 = vrot.slane %v182_v36, 1  ;;  %v3213_v44 = vcombine.low %v204_v37, %v205_v39  ;;  %v3219_v56 = vcombine.low %v94_v18, %v96_v22  ;;  %v3222_v57 = vcombine.low %v100_v48, %v101_v52  ;;  %v2834_v59 = vld [vmem:[#allocation5 + $0x128] sm:$0xff]   ;;  %v2844_v37 = vld [vmem:[#allocation5 + $0x1b8] sm:$0xff]  }
  0x80   :  { %480 = vmatprep.mubr.bf16.mxu0 %v3182_v10  ;;  %v206_v63 = vrot.slane %v3215_v53, 1  ;;  %v187_v4 = vshrl.u32 %v3215_v53, 16  ;;  %v679_v22 = vrot.slane %v175_v34, 2  ;;  %v674_v39 = vor.u32 %v3194_v19, %v3191_v16  ;;  %v2845_v34 = vld [vmem:[#allocation5 + $0xf8] sm:$0xff]   ;;  %v651_v52 = vld [vmem:[#allocation8 + $0x8] sm:$0xff] }
  0x81   :  { %v185_v51 = vor.u32 %v184_v43, %v180_v35  ;;  %2561 = vmatprep.mubr.bf16.mxu1 %v3213_v44  ;;  %v207_v1 = vrot.slane %v3222_v57, 1  ;;  %v194_v6 = vshrl.u32 %v3222_v57, 16 }
  0x82   :  { %2361 = vmatpush3.bf16.msra.mxu1 %v2815_v60  ;;  %2321 = vmatpush3.bf16.msra.mxu0 %v2814_v3  ;;  %v671_v60 = vor.u32 %v3189_v15, %v3187_v14  ;;  %v2837_v3 = vld [vmem:[#allocation5 + $0x168] sm:$0xff]   ;;  %v2840_v15 = vld [vmem:[#allocation5 + $0x1b0] sm:$0xff]   ;;  %v684_v42 = vrot.slane %v187_v4, 1  ;;  %v680_v19 = vor.u32 %v679_v22, %v3226_v61  ;;  %v653_v61 = vld [vmem:[#allocation8 + $0x18] sm:$0xff] }
  0x83   :  { %2362 = vmatprep.subr.bf16.mxu1 %v2818_v2  ;;  %2322 = vmatprep.subr.bf16.mxu0 %v2817_v5  ;;  %v3228_v62 = vcombine.low %v178_v49, %v185_v51  ;;  %v2836_v2 = vld [vmem:[#allocation5 + $0xe8] sm:$0xff]   ;;  %v189_v5 = vshll.u32 %v3215_v53, 16  ;;  %v3238_v9 = vcombine.low %v206_v63, %v207_v1  ;;  %v687_v45 = vrot.slane %v194_v6, 1  ;;  %v665_v22 = vld [vmem:[#allocation8 + $0x78] sm:$0xff] }
  0x84   :  { %v650_v51 = vld [vmem:[#allocation8] sm:$0xff]  ;;  %v655_v1 = vld [vmem:[#allocation8 + $0x28] sm:$0xff] }
  0x85   :  { %481 = vmatmul.mubr.bf16.gmra.mrb[4].mxu0 %v3185_v11  ;;  %2562 = vmatmul.mubr.bf16.gmra.mrb[4].mxu1 %v3238_v9  ;;  %v685_v43 = vrot.slane %v189_v5, 2 }
  0x86   :  { %2363 = vmatpush3.bf16.msra.mxu1 %v2820_v8  ;;  %2323 = vmatpush3.bf16.msra.mxu0 %v2819_v7  ;;  %v196_v7 = vshll.u32 %v3222_v57, 16  ;;  %v2839_v8 = vld [vmem:[#allocation5 + $0x130] sm:$0xff]  }
  0x87   :  { %2364 = vmatprep.subr.bf16.mxu1 %v2822_v13  ;;  %2324 = vmatprep.subr.bf16.mxu0 %v2821_v12  ;;  %v3240_v12 = vcombine.low %v668_v54, %v671_v60  ;;  %v191_v13 = vrot.slane %v189_v5, 1  ;;  %v2719_v54 = vpack.c.bf16 %v651_v52, %v650_v51  ;;  %v652_v60 = vld [vmem:[#allocation8 + $0x10] sm:$0xff] }
  0x88   :  { %488 = vmatprep.mubr.bf16.mxu0 %v3228_v62  ;;  %v198_v14 = vrot.slane %v196_v7, 1  ;;  %v688_v46 = vrot.slane %v196_v7, 2  ;;  %v2722_v63 = vpack.c.bf16 %v653_v61, %v652_v60  ;;  %v659_v7 = vld [vmem:[#allocation8 + $0x48] sm:$0xff]  ;;  %v1183_v52 = vld [vmem:[#allocation8 + $0xd0] sm:$0xff]  ;;  %v1185_v61 = vld [vmem:[#allocation8 + $0xe0] sm:$0xff] }
  0x89   :  { %v192_v18 = vor.u32 %v191_v13, %v187_v4  ;;  %1059 = vmatprep.mubr.bf16.mxu1 %v3240_v12  ;;  %v657_v4 = vld [vmem:[#allocation8 + $0x38] sm:$0xff]  ;;  %v660_v13 = vld [vmem:[#allocation8 + $0x50] sm:$0xff] }
  0x8a   :  { %2365 = vmatpush3.bf16.msra.mxu1 %v2824_v17  ;;  %2325 = vmatpush3.bf16.msra.mxu0 %v2823_v20  ;;  %v2841_v17 = vld [vmem:[#allocation5 + $0xf0] sm:$0xff]   ;;  %v199_v20 = vor.u32 %v198_v14, %v194_v6  ;;  %v689_v48 = vor.u32 %v688_v46, %v687_v45  ;;  %v658_v6 = vld [vmem:[#allocation8 + $0x40] sm:$0xff]  ;;  %v661_v14 = vld [vmem:[#allocation8 + $0x58] sm:$0xff] }
  0x8b   :  { %2366 = vmatprep.subr.bf16.mxu1 %v2829_v29  ;;  %2326 = vmatprep.subr.bf16.mxu0 %v2828_v26  ;;  %v2843_v26 = vld [vmem:[#allocation5 + $0x138] sm:$0xff]   ;;  %v681_v29 = vrot.slane %v180_v35, 1 }
  0x8c   :  { %v3246_v32 = vcombine.low %v192_v18, %v199_v20  ;;  %v2846_v35 = vld [vmem:[#allocation5 + $0x178] sm:$0xff]   ;;  %v663_v18 = vld [vmem:[#allocation8 + $0x68] sm:$0xff] }
  0x8d   :  { %489 = vmatmul.mubr.bf16.gmra.mrb[8].mxu0 %v3219_v56  ;;  %v1179_v46 = vld [vmem:[#allocation8 + $0xb0] sm:$0xff] }
  0x8e   :  { %2367 = vmatpush3.bf16.msra.mxu1 %v2831_v41  ;;  %2327 = vmatpush3.bf16.msra.mxu0 %v2830_v40  ;;  %v677_v40 = vor.u32 %v3203_v31, %v3201_v28  ;;  %v682_v41 = vrot.slane %v182_v36, 2  ;;  %v686_v36 = vor.u32 %v685_v43, %v684_v42  ;;  %v1178_v43 = vld [vmem:[#allocation8 + $0xa8] sm:$0xff] }
  0x8f   :  { %2328 = vmatprep.subr.bf16.mxu0 %v2834_v59  ;;  %2368 = vmatprep.subr.bf16.mxu1 %v2835_v0  ;;  %v3036_v59 = vmov 0.0|0.0   ;;  %v654_v0 = vld [vmem:[#allocation8 + $0x20] sm:$0xff] }
  0x90   :  { %496 = vmatprep.mubr.bf16.mxu0 %v3246_v32  ;;  %v3257_v16 = vcombine.low %v674_v39, %v677_v40  ;;  %v683_v28 = vor.u32 %v682_v41, %v681_v29  ;;  %v3270_v49 = vcombine.low %v686_v36, %v689_v48  ;;  %v1173_v29 = vld [vmem:[#allocation8 + $0x80] sm:$0xff]  ;;  %v3038_v40 = vmov 0.0   ;;  %v1175_v41 = vld [vmem:[#allocation8 + $0x90] sm:$0xff]  ;;  %v1182_v48 = vld [vmem:[#allocation8 + $0xc8] sm:$0xff] }
  0x91   :  { %v1181_v36 = vld [vmem:[#allocation8 + $0xc0] sm:$0xff] }
  0x92   :  { %2369 = vmatpush3.bf16.msra.mxu1 %v2837_v3  ;;  %2329 = vmatpush3.bf16.msra.mxu0 %v2836_v2  ;;  %v3264_v31 = vcombine.low %v680_v19, %v683_v28  ;;  %v2725_v2 = vpack.c.bf16 %v655_v1, %v654_v0  ;;  %v656_v3 = vld [vmem:[#allocation8 + $0x30] sm:$0xff]  ;;  %v1180_v19 = vld [vmem:[#allocation8 + $0xb8] sm:$0xff]  ;;  %v2707_v51 = vpack.c.bf16 %v1182_v48, %v1181_v36 }
  0x93   :  { %2330 = vmatprep.subr.bf16.mxu0 %v2839_v8  ;;  %2370 = vmatprep.subr.bf16.mxu1 %v2840_v15  ;;  %v2728_v5 = vpack.c.bf16 %v657_v4, %v656_v3  ;;  %v2731_v8 = vpack.c.bf16 %v659_v7, %v658_v6  ;;  %v2734_v15 = vpack.c.bf16 %v661_v14, %v660_v13  ;;  %v1187_v1 = vld [vmem:[#allocation8 + $0xf0] sm:$0xff]  ;;  %v2848_v4 = vld [vmem:[#allocation5 + $0x280] sm:$0xff]   ;;  %v102_v6 = vlaneseq }
  0x94   :  { %v2704_v28 = vpack.c.bf16 %v1180_v19, %v1179_v46 }
  0x95   :  { %497 = vmatmul.mubr.bf16.gmra.mrb[12].mxu0 %v3243_v23 }
  0x96   :  { %2371 = vmatpush3.bf16.msra.mxu1 %v2842_v21  ;;  %2331 = vmatpush3.bf16.msra.mxu0 %v2841_v17  ;;  %v662_v17 = vld [vmem:[#allocation8 + $0x60] sm:$0xff]  ;;  %v664_v21 = vld [vmem:[#allocation8 + $0x70] sm:$0xff] }
  0x97   :  { %2332 = vmatprep.subr.bf16.mxu0 %v2843_v26  ;;  %2372 = vmatprep.subr.bf16.mxu1 %v2844_v37  ;;  %v2737_v20 = vpack.c.bf16 %v663_v18, %v662_v17  ;;  %v2740_v26 = vpack.c.bf16 %v665_v22, %v664_v21  ;;  %v1174_v37 = vld [vmem:[#allocation8 + $0x88] sm:$0xff] }
  0x98   :  { %994 = vmatprep.mubr.bf16.mxu0 %v3171_v58  ;;  %v2695_v39 = vpack.c.bf16 %v1174_v37, %v1173_v29 }
  0x9a   :  { %2373 = vmatpush3.bf16.msra.mxu1 %v2846_v35  ;;  %2333 = vmatpush3.bf16.msra.mxu0 %v2845_v34  ;;  %v1176_v34 = vld [vmem:[#allocation8 + $0x98] sm:$0xff]  ;;  %v1177_v35 = vld [vmem:[#allocation8 + $0xa0] sm:$0xff] }
  0x9b   :  { %2718 = vmatprep.subr.bf16.mxu1 %v3036_v59  ;;  %2694 = vmatprep.subr.bf16.mxu0 %v3036_v59  ;;  %v2698_v42 = vpack.c.bf16 %v1176_v34, %v1175_v41  ;;  %v2701_v45 = vpack.c.bf16 %v1178_v43, %v1177_v35 }
  0x9d   :  { %1060 = vmatmul.mubr.bf16.vlgmr.msra.gmra.mrb[8].mxu1 %v3162_v47  ;;  %995 = vmatmul.mubr.bf16.vlgmr.msra.gmra.mrb[16].mxu0 %v3168_v55 }
  0x9e   :  { %1067 = vmatprep.mubr.bf16.mxu1 %v3257_v16  ;;  %1002 = vmatprep.mubr.bf16.mxu0 %v3182_v10 }
  0x9f   :  { %2720 = vmatpush3.bf16.msra.mxu1 %v2719_v54  ;;  %2696 = vmatpush3.bf16.msra.mxu0 %v2695_v39  ;;  %v1184_v54 = vld [vmem:[#allocation8 + $0xd8] sm:$0xff] }
  0xa0   :  { %2721 = vmatprep.subr.bf16.mxu1 %v3036_v59  ;;  %2697 = vmatprep.subr.bf16.mxu0 %v3036_v59  ;;  %v2710_v60 = vpack.c.bf16 %v1184_v54, %v1183_v52 }
  0xa3   :  { %2723 = vmatpush3.bf16.msra.mxu1 %v2722_v63  ;;  %2699 = vmatpush3.bf16.msra.mxu0 %v2698_v42  ;;  %v1186_v63 = vld [vmem:[#allocation8 + $0xe8] sm:$0xff] }
  0xa4   :  { %2724 = vmatprep.subr.bf16.mxu1 %v3036_v59  ;;  %2700 = vmatprep.subr.bf16.mxu0 %v3036_v59  ;;  %v2713_v0 = vpack.c.bf16 %v1186_v63, %v1185_v61 }
  0xa5   :  { %1068 = vmatmul.mubr.bf16.gmra.mrb[12].mxu1 %v3164_v50  ;;  %1003 = vmatmul.mubr.bf16.gmra.mrb[20].mxu0 %v3185_v11 }
  0xa6   :  { %1075 = vmatprep.mubr.bf16.mxu1 %v3264_v31  ;;  %1010 = vmatprep.mubr.bf16.mxu0 %v3228_v62 }
  0xa7   :  { %2726 = vmatpush3.bf16.msra.mxu1 %v2725_v2  ;;  %2702 = vmatpush3.bf16.msra.mxu0 %v2701_v45  ;;  %v1188_v2 = vld [vmem:[#allocation8 + $0xf8] sm:$0xff] }
  0xa8   :  { %2727 = vmatprep.subr.bf16.mxu1 %v3036_v59  ;;  %2703 = vmatprep.subr.bf16.mxu0 %v3036_v59  ;;  %v2716_v3 = vpack.c.bf16 %v1188_v2, %v1187_v1 }
  0xab   :  { %2729 = vmatpush3.bf16.msra.mxu1 %v2728_v5  ;;  %2705 = vmatpush3.bf16.msra.mxu0 %v2704_v28  ;;  %v2847_v5 = vld [vmem:[#allocation5 + $0x200] sm:$0xff]  }
  0xac   :  { %2730 = vmatprep.subr.bf16.mxu1 %v3036_v59  ;;  %2706 = vmatprep.subr.bf16.mxu0 %v3036_v59 }
  0xad   :  { %1076 = vmatmul.mubr.bf16.gmra.mrb[16].mxu1 %v3213_v44  ;;  %1011 = vmatmul.mubr.bf16.gmra.mrb[24].mxu0 %v3219_v56 }
  0xae   :  { %1083 = vmatprep.mubr.bf16.mxu1 %v3270_v49  ;;  %1018 = vmatprep.mubr.bf16.mxu0 %v3246_v32 }
  0xaf   :  { %2732 = vmatpush3.bf16.msra.mxu1 %v2731_v8  ;;  %2708 = vmatpush3.bf16.msra.mxu0 %v2707_v51  ;;  %v3298_v8 = vshrl.u32 %v102_v6, 7 }
  0xb0   :  { %2733 = vmatprep.subr.bf16.mxu1 %v3036_v59  ;;  %2709 = vmatprep.subr.bf16.mxu0 %v3036_v59 }
  0xb1   :  { %vm570_vm1 = vcmp.lt.s32.totalorder %v3298_v8, 6  ;;  %vm1092_vm5 = vcmp.lt.s32.totalorder %v3298_v8, 5  ;;  %vm1921_vm10 = vcmp.lt.s32.totalorder %v3298_v8, 4 }
  0xb3   :  { %2735 = vmatpush3.bf16.msra.mxu1 %v2734_v15  ;;  %2711 = vmatpush3.bf16.msra.mxu0 %v2710_v60 }
  0xb4   :  { %2736 = vmatprep.subr.bf16.mxu1 %v3036_v59  ;;  %2712 = vmatprep.subr.bf16.mxu0 %v3036_v59 }
  0xb5   :  { %1084 = vmatmul.mubr.bf16.gmra.mrb[20].mxu1 %v3238_v9  ;;  %1019 = vmatmul.mubr.bf16.gmra.mrb[28].mxu0 %v3243_v23 }
  0xb6   :  { %2632 = vmatprep.mubr.msk.f32.mxu1 %vm3037_vm0, %v3038_v40  ;;  %2597 = vmatprep.mubr.msk.f32.mxu0 %vm3037_vm0, %v3038_v40 }
  0xb7   :  { %2738 = vmatpush3.bf16.msra.mxu1 %v2737_v20  ;;  %2714 = vmatpush3.bf16.msra.mxu0 %v2713_v0 }
  0xb8   :  { %2739 = vmatprep.subr.bf16.mxu1 %v3036_v59  ;;  %2715 = vmatprep.subr.bf16.mxu0 %v3036_v59 }
  0xbb   :  { %2741 = vmatpush3.bf16.msra.mxu1 %v2740_v26  ;;  %2717 = vmatpush3.bf16.msra.mxu0 %v2716_v3 }
  0xbc   :  { %2472 = vmatprep.subr.bf16.mxu1 %v2848_v4  ;;  %2432 = vmatprep.subr.bf16.mxu0 %v2847_v5  ;;  %v3309_v5 = vld [vmem:[#allocation7] ss:$0 sm:$0xff] }
 0x150   :  { %v2559_v7 = vpop.f32.mrb[0].mxu1  ;;  %v2282_v14 = vpop.f32.mrb[0].mxu0 }
 0x151   :  { %v539_v13 = vpop.f32.mrb[1].mxu1  ;;  %v2283_v17 = vpop.f32.mrb[1].mxu0 }
 0x152   :  { %v2560_v15 = vpop.f32.mrb[2].mxu1  ;;  %v2284_v20 = vadd.f32 %v2283_v17, %v2282_v14  ;;  %v2285_v21 = vpop.f32.mrb[2].mxu0 }
 0x153   :  { %v542_v18 = vpop.f32.mrb[3].mxu1  ;;  %v2286_v22 = vpop.f32.mrb[3].mxu0 }
 0x154   :  { %v540_v26 = vadd.f32 %v2284_v20, %v539_v13  ;;  %v2287_v29 = vadd.f32 %v2286_v22, %v2285_v21 }
 0x156   :  { %v573_v37 = vsel %vm570_vm1, %v540_v26, -1e+30  ;;  %v543_v39 = vadd.f32 %v2287_v29, %v542_v18 }
 0x157   :  { %v581_v41 = vrot.slane %v573_v37, 4 }
 0x158   :  { %v574_v34 = vsel %vm570_vm1, %v543_v39, -1e+30  ;;  %v2288_v42 = vpop.f32.mrb[4].mxu0  ;;  %v2563_v39 = vpop.f32.mrb[4].mxu1 }
 0x159   :  { %v582_v35 = vmax.f32 %v573_v37, %v581_v41  ;;  %v587_v43 = vrot.slane %v574_v34, 4  ;;  %v2289_v45 = vpop.f32.mrb[5].mxu0 }
 0x15a   :  { %v2290_v46 = vadd.f32 %v2289_v45, %v2288_v42  ;;  %v2291_v19 = vpop.f32.mrb[6].mxu0  ;;  %v555_v42 = vpop.f32.mrb[5].mxu1 }
 0x15b   :  { %v583_v28 = vrot.slane %v582_v35, 2  ;;  %v588_v36 = vmax.f32 %v574_v34, %v587_v43  ;;  %v2292_v48 = vpop.f32.mrb[7].mxu0 }
 0x15c   :  { %v548_v51 = vadd.f32 %v2559_v7, %v2290_v46  ;;  %v2293_v52 = vadd.f32 %v2292_v48, %v2291_v19  ;;  %v2564_v19 = vpop.f32.mrb[6].mxu1 }
 0x15d   :  { %v584_v54 = vmax.f32 %v582_v35, %v583_v28  ;;  %v589_v60 = vrot.slane %v588_v36, 2  ;;  %v558_v48 = vpop.f32.mrb[7].mxu1 }
 0x15e   :  { %v575_v61 = vsel %vm570_vm1, %v548_v51, -1e+30  ;;  %v551_v63 = vadd.f32 %v2560_v15, %v2293_v52 }
 0x15f   :  { %v585_v0 = vrot.slane %v584_v54, 1  ;;  %v590_v1 = vmax.f32 %v588_v36, %v589_v60  ;;  %v593_v2 = vrot.slane %v575_v61, 4 }
 0x160   :  { %v576_v3 = vsel %vm570_vm1, %v551_v63, -1e+30  ;;  %v2294_v20 = vpop.f32.mrb[8].mxu0 }
 0x161   :  { %v586_v4 = vmax.f32 %v584_v54, %v585_v0  ;;  %v591_v6 = vrot.slane %v590_v1, 1  ;;  %v594_v13 = vmax.f32 %v575_v61, %v593_v2  ;;  %v599_v14 = vrot.slane %v576_v3, 4  ;;  %v2295_v22 = vpop.f32.mrb[9].mxu0 }
 0x162   :  { %v2297_v37 = vpop.f32.mrb[10].mxu0  ;;  %v2296_v41 = vadd.f32 %v2295_v22, %v2294_v20 }
 0x163   :  { %v592_v7 = vmax.f32 %v590_v1, %v591_v6  ;;  %v595_v17 = vrot.slane %v594_v13, 2  ;;  %v600_v18 = vmax.f32 %v576_v3, %v599_v14  ;;  %v634_v21 = vadd.f32 %v3309_v5, %v586_v4  ;;  %v2298_v34 = vpop.f32.mrb[11].mxu0 }
 0x164   :  { %v2299_v46 = vadd.f32 %v2298_v34, %v2297_v37  ;;  %v556_v36 = vadd.f32 %v2296_v41, %v555_v42 }
 0x165   :  { %v635_v15 = vadd.f32 %v3309_v5, %v592_v7  ;;  %v596_v26 = vmax.f32 %v594_v13, %v595_v17  ;;  %v601_v29 = vrot.slane %v600_v18, 2  ;;  %v642_v28 = vmax.f32 %v634_v21, 0.0 }
 0x166   :  { %v559_v60 = vadd.f32 %v2299_v46, %v558_v48  ;;  %v577_v61 = vsel %vm570_vm1, %v556_v36, -1e+30 }
 0x167   :  { %v643_v35 = vmax.f32 %v635_v15, 0.0  ;;  %v597_v43 = vrot.slane %v596_v26, 1  ;;  %v602_v45 = vmax.f32 %v600_v18, %v601_v29  ;;  %v605_v2 = vrot.slane %v577_v61, 4 }
 0x168   :  { %v2300_v3 = vpop.f32.mrb[12].mxu0  ;;  %v578_v4 = vsel %vm570_vm1, %v559_v60, -1e+30 }
 0x169   :  { %v1297_v51 = vrot.slane %v643_v35, 7  ;;  %v598_v52 = vmax.f32 %v596_v26, %v597_v43  ;;  %v603_v54 = vrot.slane %v602_v45, 1  ;;  %v2301_v6 = vpop.f32.mrb[13].mxu0  ;;  %v606_v7 = vmax.f32 %v577_v61, %v605_v2 }
 0x16a   :  { %v611_v17 = vrot.slane %v578_v4, 4  ;;  %v2303_v18 = vpop.f32.mrb[14].mxu0  ;;  %v2302_v20 = vadd.f32 %v2301_v6, %v2300_v3 }
 0x16b   :  { %v1298_v63 = vsel %vm1198_vm2, %v1297_v51, %v642_v28  ;;  %v636_v0 = vadd.f32 %v3309_v5, %v598_v52  ;;  %v604_v1 = vmax.f32 %v602_v45, %v603_v54  ;;  %v2304_v21 = vpop.f32.mrb[15].mxu0  ;;  %v607_v26 = vrot.slane %v606_v7, 2 }
 0x16c   :  { %v612_v29 = vmax.f32 %v578_v4, %v611_v17  ;;  %v564_v41 = vadd.f32 %v2563_v39, %v2302_v20  ;;  %v2305_v34 = vadd.f32 %v2304_v21, %v2303_v18 }
 0x16d   :  { %v644_v13 = vmax.f32 %v636_v0, 0.0  ;;  %v637_v14 = vadd.f32 %v3309_v5, %v604_v1  ;;  %v608_v43 = vmax.f32 %v606_v7, %v607_v26 }
 0x16e   :  { %v613_v45 = vrot.slane %v612_v29, 2  ;;  %v579_v36 = vsel %vm570_vm1, %v564_v41, -1e+30  ;;  %v567_v48 = vadd.f32 %v2564_v19, %v2305_v34 }
 0x16f   :  { %v1299_v22 = vrot.slane %v644_v13, 6  ;;  %v645_v15 = vmax.f32 %v637_v14, 0.0  ;;  %v609_v54 = vrot.slane %v608_v43, 1  ;;  %v617_v61 = vrot.slane %v579_v36, 4 }
 0x170   :  { %v2374_v37 = vpop.f32.mrb[8].mxu1  ;;  %v614_v60 = vmax.f32 %v612_v29, %v613_v45  ;;  %v2334_v0 = vpop.f32.mrb[16].mxu0  ;;  %v580_v1 = vsel %vm570_vm1, %v567_v48, -1e+30 }
 0x171   :  { %v2375_v42 = vpop.f32.mrb[9].mxu1  ;;  %v1301_v35 = vrot.slane %v645_v15, 5  ;;  %v1300_v52 = vsel %vm1201_vm3, %v1299_v22, %v1298_v63  ;;  %v2335_v2 = vpop.f32.mrb[17].mxu0  ;;  %v610_v4 = vmax.f32 %v608_v43, %v609_v54  ;;  %v618_v13 = vmax.f32 %v579_v36, %v617_v61 }
 0x172   :  { %v2376_v46 = vadd.f32 %v2375_v42, %v2374_v37  ;;  %v2377_v28 = vpop.f32.mrb[10].mxu1  ;;  %v615_v6 = vrot.slane %v614_v60, 1  ;;  %v623_v14 = vrot.slane %v580_v1, 4  ;;  %v2337_v7 = vpop.f32.mrb[18].mxu0  ;;  %v2336_v19 = vadd.f32 %v2335_v2, %v2334_v0 }
 0x173   :  { %v2378_v51 = vpop.f32.mrb[11].mxu1  ;;  %v1302_v3 = vsel %vm1204_vm4, %v1301_v35, %v1300_v52  ;;  %v2338_v63 = vpop.f32.mrb[19].mxu0  ;;  %v638_v17 = vadd.f32 %v3309_v5, %v610_v4  ;;  %v619_v20 = vrot.slane %v618_v13, 2 }
 0x174   :  { %v2379_v39 = vadd.f32 %v2378_v51, %v2377_v28  ;;  %v616_v18 = vmax.f32 %v614_v60, %v615_v6  ;;  %v624_v21 = vmax.f32 %v580_v1, %v623_v14  ;;  %v1062_v15 = vadd.f32 %v2376_v46, %v2336_v19 }
 0x175   :  { %v2339_v26 = vadd.f32 %v2338_v63, %v2337_v7  ;;  %v646_v37 = vmax.f32 %v638_v17, 0.0  ;;  %v620_v34 = vmax.f32 %v618_v13, %v619_v20 }
 0x176   :  { %v639_v41 = vadd.f32 %v3309_v5, %v616_v18  ;;  %v625_v42 = vrot.slane %v624_v21, 2  ;;  %v1095_v43 = vsel %vm1092_vm5, %v1062_v15, -1e+30 }
 0x177   :  { %v1065_v45 = vadd.f32 %v2379_v39, %v2339_v26  ;;  %v1303_v48 = vrot.slane %v646_v37, 4  ;;  %v621_v52 = vrot.slane %v620_v34, 1  ;;  %v1103_v60 = vrot.slane %v1095_v43, 4 }
 0x178   :  { %v2380_v22 = vpop.f32.mrb[12].mxu1  ;;  %v647_v51 = vmax.f32 %v639_v41, 0.0  ;;  %v626_v54 = vmax.f32 %v624_v21, %v625_v42  ;;  %v2340_v46 = vpop.f32.mrb[20].mxu0 }
 0x179   :  { %v2381_v29 = vpop.f32.mrb[13].mxu1  ;;  %v1096_v61 = vsel %vm1092_vm5, %v1065_v45, -1e+30  ;;  %v2341_v0 = vpop.f32.mrb[21].mxu0  ;;  %v622_v4 = vmax.f32 %v620_v34, %v621_v52  ;;  %v1104_v14 = vmax.f32 %v1095_v43, %v1103_v60  ;;  %v1304_v63 = vsel %vm1207_vm6, %v1303_v48, %v1302_v3 }
 0x17a   :  { %v2383_v35 = vpop.f32.mrb[14].mxu1  ;;  %v2382_v28 = vadd.f32 %v2381_v29, %v2380_v22  ;;  %v1305_v2 = vrot.slane %v647_v51, 3  ;;  %v627_v6 = vrot.slane %v626_v54, 1  ;;  %v1109_v13 = vrot.slane %v1096_v61, 4  ;;  %v2343_v39 = vpop.f32.mrb[22].mxu0 }
 0x17b   :  { %v2384_v36 = vpop.f32.mrb[15].mxu1  ;;  %v2342_v7 = vadd.f32 %v2341_v0, %v2340_v46  ;;  %v2344_v19 = vpop.f32.mrb[23].mxu0  ;;  %v640_v17 = vadd.f32 %v3309_v5, %v622_v4  ;;  %v1105_v15 = vrot.slane %v1104_v14, 2  ;;  %v3341_v4 = vld [vmem:[#allocation7 + $0x1] ss:$0 sm:$0xff] }
 0x17c   :  { %v2385_v1 = vadd.f32 %v2384_v36, %v2383_v35  ;;  %v628_v18 = vmax.f32 %v626_v54, %v627_v6  ;;  %v1110_v20 = vmax.f32 %v1096_v61, %v1109_v13  ;;  %v2345_v21 = vadd.f32 %v2344_v19, %v2343_v39 }
 0x17d   :  { %v1070_v26 = vadd.f32 %v2382_v28, %v2342_v7  ;;  %v1306_v37 = vsel %vm1210_vm7, %v1305_v2, %v1304_v63  ;;  %v648_v41 = vmax.f32 %v640_v17, 0.0  ;;  %v1106_v45 = vmax.f32 %v1104_v14, %v1105_v15 }
 0x17e   :  { %v1111_v34 = vrot.slane %v1110_v20, 2  ;;  %v1073_v42 = vadd.f32 %v2385_v1, %v2345_v21  ;;  %v641_v48 = vadd.f32 %v3309_v5, %v628_v18  ;;  %v2850_v18 = vld [vmem:[#allocation5 + $0x240] sm:$0xff]  }
 0x17f   :  { %v1097_v3 = vsel %vm1092_vm5, %v1070_v26, -1e+30  ;;  %v1107_v60 = vrot.slane %v1106_v45, 1  ;;  %v1307_v2 = vrot.slane %v648_v41, 2 }
 0x180   :  { %v2386_v22 = vpop.f32.mrb[16].mxu1  ;;  %v1112_v51 = vmax.f32 %v1110_v20, %v1111_v34  ;;  %v1115_v52 = vrot.slane %v1097_v3, 4  ;;  %v1098_v28 = vsel %vm1092_vm5, %v1073_v42, -1e+30  ;;  %v2346_v54 = vpop.f32.mrb[24].mxu0  ;;  %v649_v1 = vmax.f32 %v641_v48, 0.0 }
 0x181   :  { %v2387_v29 = vpop.f32.mrb[17].mxu1  ;;  %v1121_v61 = vrot.slane %v1098_v28, 4  ;;  %v2347_v0 = vpop.f32.mrb[25].mxu0  ;;  %v1108_v5 = vmax.f32 %v1106_v45, %v1107_v60  ;;  %v1308_v63 = vsel %vm1213_vm8, %v1307_v2, %v1306_v37 }
 0x182   :  { %v2388_v35 = vadd.f32 %v2387_v29, %v2386_v22  ;;  %v2389_v43 = vpop.f32.mrb[18].mxu1  ;;  %v1113_v6 = vrot.slane %v1112_v51, 1  ;;  %v1116_v13 = vmax.f32 %v1097_v3, %v1115_v52  ;;  %v2348_v39 = vadd.f32 %v2347_v0, %v2346_v54  ;;  %v2349_v14 = vpop.f32.mrb[26].mxu0  ;;  %v2852_v29 = vld [vmem:[#allocation5 + $0x288] sm:$0xff]  }
 0x183   :  { %v2390_v36 = vpop.f32.mrb[19].mxu1  ;;  %v1122_v7 = vmax.f32 %v1098_v28, %v1121_v61  ;;  %v2350_v19 = vpop.f32.mrb[27].mxu0  ;;  %v1309_v17 = vrot.slane %v649_v1, 1  ;;  %v1156_v41 = vadd.f32 %v3341_v4, %v1108_v5  ;;  %v2854_v54 = vld [vmem:[#allocation5 + $0x248] sm:$0xff]  }
 0x184   :  { %v2391_v46 = vadd.f32 %v2390_v36, %v2389_v43  ;;  %v1114_v20 = vmax.f32 %v1112_v51, %v1113_v6  ;;  %v1117_v21 = vrot.slane %v1116_v13, 2  ;;  %v1078_v22 = vadd.f32 %v2388_v35, %v2348_v39  ;;  %v2856_v6 = vld [vmem:[#allocation5 + $0x290] sm:$0xff]  }
 0x185   :  { %v2351_v15 = vadd.f32 %v2350_v19, %v2349_v14  ;;  %v1123_v34 = vrot.slane %v1122_v7, 2  ;;  %v1310_v42 = vsel %vm1216_vm9, %v1309_v17, %v1308_v63  ;;  %v1164_v5 = vmax.f32 %v1156_v41, 0.0 }
 0x186   :  { %v1157_v45 = vadd.f32 %v3341_v4, %v1114_v20  ;;  %v1118_v3 = vmax.f32 %v1116_v13, %v1117_v21  ;;  %v1099_v37 = vsel %vm1092_vm5, %v1078_v22, -1e+30  ;;  %2633 = vmatmul.mubr.f32.vlgmr.msra.gmra.mrb[24].mxu1 %v1310_v42  ;;  %v2858_v22 = vld [vmem:[#allocation5 + $0x250] sm:$0xff]   ;;  %v2860_v42 = vld [vmem:[#allocation5 + $0x298] sm:$0xff]  }
 0x187   :  { %v1081_v36 = vadd.f32 %v2391_v46, %v2351_v15  ;;  %v1124_v51 = vmax.f32 %v1122_v7, %v1123_v34  ;;  %v1127_v35 = vrot.slane %v1099_v37, 4  ;;  %2473 = vmatpush3.bf16.msra.mxu1 %v2850_v18  ;;  %1823 = vmatprep.mubr.bf16.mxu1 %v3240_v12 }
 0x188   :  { %v2392_v26 = vpop.f32.mrb[20].mxu1  ;;  %v1165_v60 = vmax.f32 %v1157_v45, 0.0  ;;  %v1119_v61 = vrot.slane %v1118_v3, 1  ;;  %v2352_v1 = vpop.f32.mrb[28].mxu0  ;;  %2474 = vmatprep.subr.bf16.mxu1 %v2852_v29 }
 0x189   :  { %v2393_v43 = vpop.f32.mrb[21].mxu1  ;;  %v1100_v0 = vsel %vm1092_vm5, %v1081_v36, -1e+30  ;;  %v1125_v46 = vrot.slane %v1124_v51, 1  ;;  %v1128_v13 = vmax.f32 %v1099_v37, %v1127_v35  ;;  %v2353_v14 = vpop.f32.mrb[29].mxu0 }
 0x18a   :  { %v2395_v48 = vpop.f32.mrb[22].mxu1  ;;  %v2394_v52 = vadd.f32 %v2393_v43, %v2392_v26  ;;  %v1133_v39 = vrot.slane %v1100_v0, 4  ;;  %v1197_v7 = vrot.slane %v1165_v60, 7  ;;  %v1120_v19 = vmax.f32 %v1118_v3, %v1119_v61  ;;  %v2355_v17 = vpop.f32.mrb[30].mxu0  ;;  %v2864_v61 = vld [vmem:[#allocation5 + $0x2a0] sm:$0xff]  }
 0x18b   :  { %v2396_v28 = vpop.f32.mrb[23].mxu1  ;;  %v2354_v63 = vadd.f32 %v2353_v14, %v2352_v1  ;;  %v1126_v18 = vmax.f32 %v1124_v51, %v1125_v46  ;;  %v1129_v12 = vrot.slane %v1128_v13, 2  ;;  %v2356_v21 = vpop.f32.mrb[31].mxu0  ;;  %2475 = vmatpush3.bf16.msra.mxu1 %v2854_v54  ;;  %v2862_v54 = vld [vmem:[#allocation5 + $0x258] sm:$0xff]  }
 0x18c   :  { %v2397_v2 = vadd.f32 %v2396_v28, %v2395_v48  ;;  %v1134_v20 = vmax.f32 %v1100_v0, %v1133_v39  ;;  %v1199_v15 = vsel %vm1198_vm2, %v1197_v7, %v1164_v5  ;;  %v1158_v26 = vadd.f32 %v3341_v4, %v1120_v19  ;;  %2476 = vmatprep.subr.bf16.mxu1 %v2856_v6  ;;  %v2866_v19 = vld [vmem:[#allocation5 + $0x260] sm:$0xff]  }
 0x18d   :  { %v1086_v29 = vadd.f32 %v2394_v52, %v2354_v63  ;;  %v2357_v34 = vadd.f32 %v2356_v21, %v2355_v17  ;;  %v1159_v41 = vadd.f32 %v3341_v4, %v1126_v18  ;;  %v1130_v43 = vmax.f32 %v1128_v13, %v1129_v12  ;;  %v2868_v17 = vld [vmem:[#allocation5 + $0x2a8] sm:$0xff]  }
 0x18e   :  { %v1135_v45 = vrot.slane %v1134_v20, 2  ;;  %v1166_v3 = vmax.f32 %v1158_v26, 0.0 }
 0x18f   :  { %v1101_v37 = vsel %vm1092_vm5, %v1086_v29, -1e+30  ;;  %v1089_v36 = vadd.f32 %v2397_v2, %v2357_v34  ;;  %v1167_v48 = vmax.f32 %v1159_v41, 0.0  ;;  %v1131_v51 = vrot.slane %v1130_v43, 1  ;;  %2477 = vmatpush3.bf16.msra.mxu1 %v2858_v22 }
 0x190   :  { %v1136_v35 = vmax.f32 %v1134_v20, %v1135_v45  ;;  %v1139_v28 = vrot.slane %v1101_v37, 4  ;;  %v1200_v60 = vrot.slane %v1166_v3, 6  ;;  %2478 = vmatprep.subr.bf16.mxu1 %v2860_v42  ;;  %v2872_v42 = vld [vmem:[#allocation5 + $0x2b0] sm:$0xff]  }
 0x191   :  { %v1102_v52 = vsel %vm1092_vm5, %v1089_v36, -1e+30  ;;  %v1203_v0 = vrot.slane %v1167_v48, 5  ;;  %v1132_v1 = vmax.f32 %v1130_v43, %v1131_v51  ;;  %v2874_v48 = vld [vmem:[#allocation5 + $0x270] sm:$0xff]  }
 0x192   :  { %v1137_v6 = vrot.slane %v1136_v35, 1  ;;  %v1140_v46 = vmax.f32 %v1101_v37, %v1139_v28  ;;  %v1145_v13 = vrot.slane %v1102_v52, 4  ;;  %v1202_v39 = vsel %vm1201_vm3, %v1200_v60, %v1199_v15  ;;  %v2870_v15 = vld [vmem:[#allocation5 + $0x268] sm:$0xff]  }
 0x193   :  { %v1160_v2 = vadd.f32 %v3341_v4, %v1132_v1  ;;  %v1205_v7 = vsel %vm1204_vm4, %v1203_v0, %v1202_v39  ;;  %2479 = vmatpush3.bf16.msra.mxu1 %v2862_v54  ;;  %v2853_v39 = vld [vmem:[#allocation5 + $0x1c8] sm:$0xff]  }
 0x194   :  { %v1138_v14 = vmax.f32 %v1136_v35, %v1137_v6  ;;  %v1141_v5 = vrot.slane %v1140_v46, 2  ;;  %v1146_v63 = vmax.f32 %v1102_v52, %v1145_v13  ;;  %2480 = vmatprep.subr.bf16.mxu1 %v2864_v61  ;;  %v2876_v35 = vld [vmem:[#allocation5 + $0x2b8] sm:$0xff]   ;;  %v2849_v6 = vld [vmem:[#allocation5 + $0x1c0] sm:$0xff]  }
 0x195   :  { %v1168_v18 = vmax.f32 %v1160_v2, 0.0  ;;  %v2878_v52 = vld [vmem:[#allocation5 + $0x278] sm:$0xff]   ;;  %v2857_v2 = vld [vmem:[#allocation5 + $0x1d0] sm:$0xff]  }
 0x196   :  { %v1161_v12 = vadd.f32 %v3341_v4, %v1138_v14  ;;  %v1142_v20 = vmax.f32 %v1140_v46, %v1141_v5  ;;  %v1147_v21 = vrot.slane %v1146_v63, 2  ;;  %v2851_v46 = vld [vmem:[#allocation5 + $0x208] sm:$0xff]   ;;  %v2859_v14 = vld [vmem:[#allocation5 + $0x218] sm:$0xff]  }
 0x197   :  { %v1206_v22 = vrot.slane %v1168_v18, 4  ;;  %2481 = vmatpush3.bf16.msra.mxu1 %v2866_v19  ;;  %v2861_v5 = vld [vmem:[#allocation5 + $0x1d8] sm:$0xff]   ;;  %v2867_v19 = vld [vmem:[#allocation5 + $0x228] sm:$0xff]  }
 0x198   :  { %v1169_v26 = vmax.f32 %v1161_v12, 0.0  ;;  %v1143_v29 = vrot.slane %v1142_v20, 1  ;;  %v1148_v34 = vmax.f32 %v1146_v63, %v1147_v21  ;;  %2482 = vmatprep.subr.bf16.mxu1 %v2868_v17  ;;  %v2873_v63 = vld [vmem:[#allocation5 + $0x1f0] sm:$0xff]   ;;  %v2875_v17 = vld [vmem:[#allocation5 + $0x238] sm:$0xff]   ;;  %v2880_v18 = vld [vmem:[#allocation5 + $0x2c8] sm:$0xff]   ;;  %v1385_v21 = vrot.slane %v3155_v38, 2 }
 0x199   :  { %v1208_v45 = vsel %vm1207_vm6, %v1206_v22, %v1205_v7  ;;  %v2863_v7 = vld [vmem:[#allocation5 + $0x220] sm:$0xff]   ;;  %v2885_v12 = vld [vmem:[#allocation5 + $0x2f0] sm:$0xff]   ;;  %v1388_v22 = vrot.slane %v3215_v53, 2 }
 0x19a   :  { %v1209_v41 = vrot.slane %v1169_v26, 3  ;;  %v1144_v43 = vmax.f32 %v1142_v20, %v1143_v29  ;;  %v1149_v3 = vrot.slane %v1148_v34, 1  ;;  %v1384_v20 = vrot.slane %v3150_v33, 2  ;;  %v2002_v33 = vld [vmem:[#allocation8 + $0x100] sm:$0xff]  ;;  %v2003_v38 = vld [vmem:[#allocation8 + $0x108] sm:$0xff] }
 0x19b   :  { %2483 = vmatpush3.bf16.msra.mxu1 %v2870_v15  ;;  %v1389_v26 = vrot.slane %v3222_v57, 2  ;;  %v2743_v29 = vpack.c.bf16 %v2003_v38, %v2002_v33  ;;  %v2008_v57 = vld [vmem:[#allocation8 + $0x130] sm:$0xff] }
 0x19c   :  { %v1162_v37 = vadd.f32 %v3341_v4, %v1144_v43  ;;  %v1211_v36 = vsel %vm1210_vm7, %v1209_v41, %v1208_v45  ;;  %v1150_v51 = vmax.f32 %v1148_v34, %v1149_v3  ;;  %2484 = vmatprep.subr.bf16.mxu1 %v2872_v42  ;;  %v2006_v34 = vld [vmem:[#allocation8 + $0x120] sm:$0xff]  ;;  %v2007_v42 = vld [vmem:[#allocation8 + $0x128] sm:$0xff]  ;;  %v2009_v41 = vld [vmem:[#allocation8 + $0x138] sm:$0xff] }
 0x19d   :  { %v2749_v53 = vpack.c.bf16 %v2007_v42, %v2006_v34  ;;  %v2752_v43 = vpack.c.bf16 %v2009_v41, %v2008_v57  ;;  %v2010_v45 = vld [vmem:[#allocation8 + $0x140] sm:$0xff]  ;;  %v2011_v3 = vld [vmem:[#allocation8 + $0x148] sm:$0xff] }
 0x19e   :  { %v1170_v28 = vmax.f32 %v1162_v37, 0.0  ;;  %v1163_v54 = vadd.f32 %v3341_v4, %v1150_v51  ;;  %v2855_v4 = vld [vmem:[#allocation5 + $0x210] sm:$0xff]   ;;  %v2755_v37 = vpack.c.bf16 %v2011_v3, %v2010_v45 }
 0x19f   :  { %2485 = vmatpush3.bf16.msra.mxu1 %v2874_v48  ;;  %v2013_v48 = vld [vmem:[#allocation8 + $0x158] sm:$0xff] }
 0x1a0   :  { %v1212_v60 = vrot.slane %v1170_v28, 2  ;;  %v1171_v61 = vmax.f32 %v1163_v54, 0.0  ;;  %2486 = vmatprep.subr.bf16.mxu1 %v2876_v35  ;;  %v2014_v35 = vld [vmem:[#allocation8 + $0x160] sm:$0xff]  ;;  %v2015_v28 = vld [vmem:[#allocation8 + $0x168] sm:$0xff] }
 0x1a1   :  { %v2761_v54 = vpack.c.bf16 %v2015_v28, %v2014_v35 }
 0x1a2   :  { %v1214_v0 = vsel %vm1213_vm8, %v1212_v60, %v1211_v36  ;;  %v1215_v1 = vrot.slane %v1171_v61, 1  ;;  %v2012_v36 = vld [vmem:[#allocation8 + $0x150] sm:$0xff] }
 0x1a3   :  { %2487 = vmatpush3.bf16.msra.mxu1 %v2878_v52  ;;  %v2758_v51 = vpack.c.bf16 %v2013_v48, %v2012_v36  ;;  %v2016_v61 = vld [vmem:[#allocation8 + $0x170] sm:$0xff] }
 0x1a4   :  { %v1217_v13 = vsel %vm1216_vm9, %v1215_v1, %v1214_v0  ;;  %2742 = vmatprep.subr.bf16.mxu1 %v3036_v59  ;;  %v2017_v0 = vld [vmem:[#allocation8 + $0x178] sm:$0xff] }
 0x1a5   :  { %2598 = vmatmul.mubr.f32.vlgmr.msra.gmra.mrb[32].mxu0 %v1217_v13  ;;  %v2764_v1 = vpack.c.bf16 %v2017_v0, %v2016_v61 }
 0x1a6   :  { %2433 = vmatpush3.bf16.msra.mxu0 %v2849_v6  ;;  %1758 = vmatprep.mubr.bf16.mxu0 %v3171_v58  ;;  %v2865_v58 = vld [vmem:[#allocation5 + $0x1e0] sm:$0xff]  }
 0x1a7   :  { %2434 = vmatprep.subr.bf16.mxu0 %v2851_v46  ;;  %1824 = vmatmul.mubr.bf16.vlgmr.msra.gmra.mrb[28].mxu1 %v3162_v47  ;;  %v2869_v47 = vld [vmem:[#allocation5 + $0x1e8] sm:$0xff]  }
 0x1a8   :  { %1831 = vmatprep.mubr.bf16.mxu1 %v3257_v16  ;;  %v2871_v16 = vld [vmem:[#allocation5 + $0x230] sm:$0xff]   ;;  %2744 = vmatpush3.bf16.msra.mxu1 %v2743_v29 }
 0x1a9   :  { %2745 = vmatprep.subr.bf16.mxu1 %v3036_v59 }
 0x1aa   :  { %2435 = vmatpush3.bf16.msra.mxu0 %v2853_v39 }
 0x1ab   :  { %2436 = vmatprep.subr.bf16.mxu0 %v2855_v4 }
 0x1ae   :  { %2437 = vmatpush3.bf16.msra.mxu0 %v2857_v2 }
 0x1af   :  { %2438 = vmatprep.subr.bf16.mxu0 %v2859_v14  ;;  %1832 = vmatmul.mubr.bf16.gmra.mrb[32].mxu1 %v3164_v50  ;;  %v2877_v50 = vld [vmem:[#allocation5 + $0x1f8] sm:$0xff]  }
 0x1b0   :  { %1839 = vmatprep.mubr.bf16.mxu1 %v3264_v31  ;;  %v2879_v31 = vld [vmem:[#allocation5 + $0x2c0] sm:$0xff]  }
 0x1b2   :  { %2439 = vmatpush3.bf16.msra.mxu0 %v2861_v5 }
 0x1b3   :  { %2440 = vmatprep.subr.bf16.mxu0 %v2863_v7 }
 0x1b6   :  { %2441 = vmatpush3.bf16.msra.mxu0 %v2865_v58 }
 0x1b7   :  { %2442 = vmatprep.subr.bf16.mxu0 %v2867_v19  ;;  %1840 = vmatmul.mubr.bf16.gmra.mrb[36].mxu1 %v3213_v44  ;;  %v2881_v44 = vld [vmem:[#allocation5 + $0x2d0] sm:$0xff]  }
 0x1b8   :  { %1847 = vmatprep.mubr.bf16.mxu1 %v3270_v49  ;;  %v2882_v49 = vld [vmem:[#allocation5 + $0x2d8] sm:$0xff]  }
 0x1ba   :  { %2443 = vmatpush3.bf16.msra.mxu0 %v2869_v47 }
 0x1bb   :  { %2444 = vmatprep.subr.bf16.mxu0 %v2871_v16 }
 0x1be   :  { %2445 = vmatpush3.bf16.msra.mxu0 %v2873_v63 }
 0x1bf   :  { %2446 = vmatprep.subr.bf16.mxu0 %v2875_v17  ;;  %1848 = vmatmul.mubr.bf16.gmra.mrb[40].mxu1 %v3238_v9  ;;  %v2883_v9 = vld [vmem:[#allocation5 + $0x2e0] sm:$0xff]  }
 0x1c0   :  { %2691 = vmatprep.mubr.msk.f32.mxu1 %vm3037_vm0, %v3038_v40  ;;  %v2884_v40 = vld [vmem:[#allocation5 + $0x2e8] sm:$0xff]  }
 0x1c2   :  { %2447 = vmatpush3.bf16.msra.mxu0 %v2877_v50 }
 0x1c3   :  { %2635 = vmatprep.subr.bf16.mxu0 %v2879_v31 }
 0x1c5   :  { %1759 = vmatmul.mubr.bf16.vlgmr.msra.gmra.mrb[36].mxu0 %v3168_v55  ;;  %v1382_v55 = vrot.slane %v3143_v27, 2  ;;  %v1387_v27 = vrot.slane %v3199_v25, 2  ;;  %v2005_v25 = vld [vmem:[#allocation8 + $0x118] sm:$0xff] }
 0x1c6   :  { %2636 = vmatpush3.bf16.msra.mxu0 %v2879_v31  ;;  %1766 = vmatprep.mubr.bf16.mxu0 %v3182_v10  ;;  %v1383_v10 = vrot.slane %v3147_v30, 2  ;;  %v2221_v30 = vcombine.low %v1384_v20, %v1385_v21 }
 0x1c7   :  { %2637 = vmatprep.subr.bf16.mxu0 %v2880_v18 }
 0x1ca   :  { %2638 = vmatpush3.bf16.msra.mxu0 %v2880_v18 }
 0x1cb   :  { %2639 = vmatprep.subr.bf16.mxu0 %v2881_v44 }
 0x1cd   :  { %1767 = vmatmul.mubr.bf16.gmra.mrb[40].mxu0 %v3185_v11  ;;  %v2220_v11 = vcombine.low %v1382_v55, %v1383_v10 }
 0x1ce   :  { %2640 = vmatpush3.bf16.msra.mxu0 %v2881_v44  ;;  %1774 = vmatprep.mubr.bf16.mxu0 %v3228_v62  ;;  %v2886_v62 = vld [vmem:[#allocation5 + $0x2f8] sm:$0xff]  }
 0x1cf   :  { %2641 = vmatprep.subr.bf16.mxu0 %v2882_v49 }
 0x1d2   :  { %2642 = vmatpush3.bf16.msra.mxu0 %v2882_v49 }
 0x1d3   :  { %2643 = vmatprep.subr.bf16.mxu0 %v2883_v9 }
 0x1d5   :  { %1775 = vmatmul.mubr.bf16.gmra.mrb[44].mxu0 %v3219_v56  ;;  %v1386_v56 = vrot.slane %v3197_v24, 2  ;;  %v2004_v24 = vld [vmem:[#allocation8 + $0x110] sm:$0xff] }
 0x1d6   :  { %2644 = vmatpush3.bf16.msra.mxu0 %v2883_v9  ;;  %1782 = vmatprep.mubr.bf16.mxu0 %v3246_v32  ;;  %v2746_v15 = vpack.c.bf16 %v2005_v25, %v2004_v24 }
 0x1d7   :  { %2645 = vmatprep.subr.bf16.mxu0 %v2884_v40  ;;  %v2222_v32 = vcombine.low %v1386_v56, %v1387_v27 }
 0x1d8   :  { %2747 = vmatpush3.bf16.msra.mxu1 %v2746_v15 }
 0x1d9   :  { %2748 = vmatprep.subr.bf16.mxu1 %v3036_v59 }
 0x1da   :  { %2646 = vmatpush3.bf16.msra.mxu0 %v2884_v40 }
 0x1db   :  { %2647 = vmatprep.subr.bf16.mxu0 %v2885_v12 }
 0x1dc   :  { %2750 = vmatpush3.bf16.msra.mxu1 %v2749_v53 }
 0x1dd   :  { %1783 = vmatmul.mubr.bf16.gmra.mrb[48].mxu0 %v3243_v23  ;;  %v2223_v23 = vcombine.low %v1388_v22, %v1389_v26  ;;  %2751 = vmatprep.subr.bf16.mxu1 %v3036_v59 }
 0x1de   :  { %2648 = vmatpush3.bf16.msra.mxu0 %v2885_v12  ;;  %2651 = vmatprep.mubr.bf16.mxu0 %v2220_v11 }
 0x1df   :  { %2649 = vmatprep.subr.bf16.mxu0 %v2886_v62 }
 0x1e0   :  { %2753 = vmatpush3.bf16.msra.mxu1 %v2752_v43 }
 0x1e1   :  { %2754 = vmatprep.subr.bf16.mxu1 %v3036_v59 }
 0x1e2   :  { %2650 = vmatpush3.bf16.msra.mxu0 %v2886_v62 }
 0x1e4   :  { %2756 = vmatpush3.bf16.msra.mxu1 %v2755_v37 }
 0x1e5   :  { %2652 = vmatmul.mubr.bf16.vlgmr.msra.gmra.mrb[52].mxu0 %v2221_v30  ;;  %2757 = vmatprep.subr.bf16.mxu1 %v3036_v59 }
 0x1e6   :  { %2655 = vmatprep.mubr.bf16.mxu0 %v2222_v32 }
 0x1e8   :  { %2759 = vmatpush3.bf16.msra.mxu1 %v2758_v51 }
 0x1e9   :  { %2760 = vmatprep.subr.bf16.mxu1 %v3036_v59 }
 0x1ec   :  { %2762 = vmatpush3.bf16.msra.mxu1 %v2761_v54 }
 0x1ed   :  { %2656 = vmatmul.mubr.bf16.gmra.mrb[56].mxu0 %v2223_v23  ;;  %2763 = vmatprep.subr.bf16.mxu1 %v3036_v59 }
 0x1f0   :  { %2765 = vmatpush3.bf16.msra.mxu1 %v2764_v1 }
 0x259   :  { %v1378_v60 = vpop.f32.mrb[24].mxu1 }
 0x25a   :  { %v2634_v52 = vpop.f32.mrb[25].mxu1 }
 0x278   :  { %v1285_v6 = vpop.f32.mrb[32].mxu0 }
 0x279   :  { %v3402_v46 = vadd.f32 %v1378_v60, %v1285_v6  ;;  %v2599_v13 = vpop.f32.mrb[33].mxu0 }
 0x27a   :  { %v2488_v39 = vpop.f32.mrb[28].mxu1 }
 0x27b   :  { %v2489_v4 = vpop.f32.mrb[29].mxu1 }
 0x27c   :  { %v2490_v2 = vadd.f32 %v2489_v4, %v2488_v39  ;;  %v2491_v14 = vpop.f32.mrb[30].mxu1 }
 0x27d   :  { %v2492_v5 = vpop.f32.mrb[31].mxu1 }
 0x27e   :  { %v2493_v7 = vadd.f32 %v2492_v5, %v2491_v14 }
 0x282   :  { %v2494_v58 = vpop.f32.mrb[32].mxu1 }
 0x283   :  { %v2495_v19 = vpop.f32.mrb[33].mxu1 }
 0x284   :  { %v2496_v47 = vadd.f32 %v2495_v19, %v2494_v58  ;;  %v2497_v16 = vpop.f32.mrb[34].mxu1 }
 0x285   :  { %v2498_v63 = vpop.f32.mrb[35].mxu1 }
 0x286   :  { %v2499_v59 = vadd.f32 %v2498_v63, %v2497_v16 }
 0x28a   :  { %v2500_v17 = vpop.f32.mrb[36].mxu1 }
 0x28b   :  { %v2501_v50 = vpop.f32.mrb[37].mxu1 }
 0x28c   :  { %v2502_v31 = vadd.f32 %v2501_v50, %v2500_v17  ;;  %v2503_v18 = vpop.f32.mrb[38].mxu1 }
 0x28d   :  { %v2504_v44 = vpop.f32.mrb[39].mxu1 }
 0x28e   :  { %v2505_v49 = vadd.f32 %v2504_v44, %v2503_v18 }
 0x292   :  { %v2506_v9 = vpop.f32.mrb[40].mxu1 }
 0x293   :  { %v2507_v40 = vpop.f32.mrb[41].mxu1 }
 0x294   :  { %v2508_v55 = vadd.f32 %v2507_v40, %v2506_v9  ;;  %v2509_v10 = vpop.f32.mrb[42].mxu1 }
 0x295   :  { %v2510_v12 = vpop.f32.mrb[43].mxu1 }
 0x296   :  { %v2511_v11 = vadd.f32 %v2510_v12, %v2509_v10 }
 0x298   :  { %v2448_v62 = vpop.f32.mrb[36].mxu0 }
 0x299   :  { %v2449_v20 = vpop.f32.mrb[37].mxu0 }
 0x29a   :  { %v2450_v21 = vadd.f32 %v2449_v20, %v2448_v62  ;;  %v2451_v56 = vpop.f32.mrb[38].mxu0 }
 0x29b   :  { %v2452_v27 = vpop.f32.mrb[39].mxu0 }
 0x29c   :  { %v2453_v30 = vadd.f32 %v2452_v27, %v2451_v56  ;;  %v1826_v32 = vadd.f32 %v2490_v2, %v2450_v21 }
 0x29e   :  { %v1829_v22 = vadd.f32 %v2493_v7, %v2453_v30 }
 0x2a0   :  { %v2454_v26 = vpop.f32.mrb[40].mxu0 }
 0x2a1   :  { %v2455_v23 = vpop.f32.mrb[41].mxu0 }
 0x2a2   :  { %v2456_v33 = vadd.f32 %v2455_v23, %v2454_v26  ;;  %v2457_v38 = vpop.f32.mrb[42].mxu0  ;;  %v2264_v26 = vld [vmem:[#allocation7 + $0x2] ss:$0 sm:$0xff] }
 0x2a3   :  { %v2458_v29 = vpop.f32.mrb[43].mxu0 }
 0x2a4   :  { %v2459_v24 = vadd.f32 %v2458_v29, %v2457_v38  ;;  %v1834_v25 = vadd.f32 %v2496_v47, %v2456_v33 }
 0x2a6   :  { %v1837_v15 = vadd.f32 %v2499_v59, %v2459_v24 }
 0x2a8   :  { %v2460_v34 = vpop.f32.mrb[44].mxu0 }
 0x2a9   :  { %v2461_v42 = vpop.f32.mrb[45].mxu0 }
 0x2aa   :  { %v2462_v53 = vadd.f32 %v2461_v42, %v2460_v34  ;;  %v2463_v57 = vpop.f32.mrb[46].mxu0 }
 0x2ab   :  { %v2464_v41 = vpop.f32.mrb[47].mxu0 }
 0x2ac   :  { %v2465_v43 = vadd.f32 %v2464_v41, %v2463_v57  ;;  %v1842_v45 = vadd.f32 %v2502_v31, %v2462_v53 }
 0x2ae   :  { %v1845_v3 = vadd.f32 %v2505_v49, %v2465_v43 }
 0x2b0   :  { %v2466_v37 = vpop.f32.mrb[48].mxu0 }
 0x2b1   :  { %v2467_v36 = vpop.f32.mrb[49].mxu0 }
 0x2b2   :  { %v2468_v48 = vadd.f32 %v2467_v36, %v2466_v37  ;;  %v2469_v51 = vpop.f32.mrb[50].mxu0 }
 0x2b3   :  { %v2470_v35 = vpop.f32.mrb[51].mxu0 }
 0x2b4   :  { %v2471_v28 = vadd.f32 %v2470_v35, %v2469_v51  ;;  %v1850_v54 = vadd.f32 %v2508_v55, %v2468_v48 }
 0x2b6   :  { %v1853_v60 = vadd.f32 %v2511_v11, %v2471_v28 }
 0x2b8   :  { %v2653_v52 = vpop.f32.mrb[52].mxu0 }
 0x2b9   :  { %v1899_v61 = vadd.f32 %v2653_v52, %v1834_v25  ;;  %v1890_v0 = vpop.f32.mrb[53].mxu0 }
 0x2ba   :  { %v1891_v1 = vadd.f32 %v1890_v0, %v1826_v32  ;;  %v2654_v6 = vpop.f32.mrb[54].mxu0 }
 0x2bb   :  { %v1926_v13 = vsel %vm1921_vm10, %v1899_v61, -1e+30  ;;  %v1902_v39 = vadd.f32 %v2654_v6, %v1837_v15  ;;  %v1893_v4 = vpop.f32.mrb[55].mxu0 }
 0x2bc   :  { %v1944_v2 = vrot.slane %v1926_v13, 4  ;;  %v1924_v14 = vsel %vm1921_vm10, %v1891_v1, -1e+30  ;;  %v1894_v5 = vadd.f32 %v1893_v4, %v1829_v22 }
 0x2bd   :  { %v1932_v7 = vrot.slane %v1924_v14, 4  ;;  %v1927_v58 = vsel %vm1921_vm10, %v1902_v39, -1e+30 }
 0x2be   :  { %v1945_v19 = vmax.f32 %v1926_v13, %v1944_v2  ;;  %v1950_v47 = vrot.slane %v1927_v58, 4  ;;  %v1925_v16 = vsel %vm1921_vm10, %v1894_v5, -1e+30 }
 0x2bf   :  { %v1933_v63 = vmax.f32 %v1924_v14, %v1932_v7  ;;  %v1938_v59 = vrot.slane %v1925_v16, 4 }
 0x2c0   :  { %v1946_v17 = vrot.slane %v1945_v19, 2  ;;  %v1951_v50 = vmax.f32 %v1927_v58, %v1950_v47  ;;  %v2657_v31 = vpop.f32.mrb[56].mxu0 }
 0x2c1   :  { %v1934_v18 = vrot.slane %v1933_v63, 2  ;;  %v1939_v44 = vmax.f32 %v1925_v16, %v1938_v59  ;;  %v1915_v49 = vadd.f32 %v2657_v31, %v1850_v54  ;;  %v1906_v9 = vpop.f32.mrb[57].mxu0 }
 0x2c2   :  { %v1947_v40 = vmax.f32 %v1945_v19, %v1946_v17  ;;  %v1952_v55 = vrot.slane %v1951_v50, 2  ;;  %v1907_v10 = vadd.f32 %v1906_v9, %v1842_v45  ;;  %v2658_v12 = vpop.f32.mrb[58].mxu0 }
 0x2c3   :  { %v1935_v11 = vmax.f32 %v1933_v63, %v1934_v18  ;;  %v1940_v62 = vrot.slane %v1939_v44, 2  ;;  %v1930_v20 = vsel %vm1921_vm10, %v1915_v49, -1e+30  ;;  %v1918_v21 = vadd.f32 %v2658_v12, %v1853_v60  ;;  %v1909_v56 = vpop.f32.mrb[59].mxu0 }
 0x2c4   :  { %v1948_v27 = vrot.slane %v1947_v40, 1  ;;  %v1953_v30 = vmax.f32 %v1951_v50, %v1952_v55  ;;  %v1968_v32 = vrot.slane %v1930_v20, 4  ;;  %v1928_v22 = vsel %vm1921_vm10, %v1907_v10, -1e+30 }
 0x2c5   :  { %v1936_v23 = vrot.slane %v1935_v11, 1  ;;  %v1941_v33 = vmax.f32 %v1939_v44, %v1940_v62  ;;  %v1956_v38 = vrot.slane %v1928_v22, 4  ;;  %v1931_v29 = vsel %vm1921_vm10, %v1918_v21, -1e+30 }
 0x2c6   :  { %v1949_v24 = vmax.f32 %v1947_v40, %v1948_v27  ;;  %v1954_v25 = vrot.slane %v1953_v30, 1  ;;  %v1969_v15 = vmax.f32 %v1930_v20, %v1968_v32  ;;  %v1974_v34 = vrot.slane %v1931_v29, 4 }
 0x2c7   :  { %v1937_v42 = vmax.f32 %v1935_v11, %v1936_v23  ;;  %v1942_v53 = vrot.slane %v1941_v33, 1  ;;  %v1957_v57 = vmax.f32 %v1928_v22, %v1956_v38  ;;  %v1910_v41 = vadd.f32 %v1909_v56, %v1845_v3 }
 0x2c8   :  { %v1987_v43 = vadd.f32 %v2264_v26, %v1949_v24  ;;  %v1955_v45 = vmax.f32 %v1953_v30, %v1954_v25  ;;  %v1970_v37 = vrot.slane %v1969_v15, 2  ;;  %v1975_v36 = vmax.f32 %v1931_v29, %v1974_v34  ;;  %v2265_v29 = vld [vmem:[#allocation10] ss:$0 sm:$0xff] }
 0x2c9   :  { %v1943_v48 = vmax.f32 %v1941_v33, %v1942_v53  ;;  %v1958_v51 = vrot.slane %v1957_v57, 2  ;;  %v1929_v35 = vsel %vm1921_vm10, %v1910_v41, -1e+30  ;;  %v1985_v52 = vadd.f32 %v2264_v26, %v1937_v42 }
 0x2ca   :  { %v1988_v28 = vadd.f32 %v2264_v26, %v1955_v45  ;;  %v1971_v54 = vmax.f32 %v1969_v15, %v1970_v37  ;;  %v1976_v60 = vrot.slane %v1975_v36, 2  ;;  %v1962_v1 = vrot.slane %v1929_v35, 4 }
 0x2cb   :  { %v1986_v61 = vadd.f32 %v2264_v26, %v1943_v48  ;;  %v1959_v0 = vmax.f32 %v1957_v57, %v1958_v51  ;;  %v1995_v6 = vmax.f32 %v1987_v43, 0.0  ;;  %v1993_v7 = vmax.f32 %v1985_v52, 0.0 }
 0x2cc   :  { %v1996_v13 = vmax.f32 %v1988_v28, 0.0  ;;  %v1972_v39 = vrot.slane %v1971_v54, 1  ;;  %v1977_v3 = vmax.f32 %v1975_v36, %v1976_v60  ;;  %v1963_v14 = vmax.f32 %v1929_v35, %v1962_v1 }
 0x2cd   :  { %v1994_v4 = vmax.f32 %v1986_v61, 0.0  ;;  %v1960_v2 = vrot.slane %v1959_v0, 1  ;;  %v2028_v47 = vrot.slane %v1995_v6, 6 }
 0x2ce   :  { %v1978_v5 = vrot.slane %v1977_v3, 1  ;;  %v1964_v8 = vrot.slane %v1963_v14, 2  ;;  %v2030_v16 = vrot.slane %v1996_v13, 5  ;;  %v1973_v63 = vmax.f32 %v1971_v54, %v1972_v39 }
 0x2cf   :  { %v2026_v58 = vrot.slane %v1994_v4, 7  ;;  %v1961_v19 = vmax.f32 %v1959_v0, %v1960_v2 }
 0x2d0   :  { %v1979_v50 = vmax.f32 %v1977_v3, %v1978_v5  ;;  %v1965_v31 = vmax.f32 %v1963_v14, %v1964_v8  ;;  %v1991_v40 = vadd.f32 %v2264_v26, %v1973_v63 }
 0x2d1   :  { %v2027_v59 = vsel %vm1198_vm2, %v2026_v58, %v1993_v7  ;;  %v1989_v17 = vadd.f32 %v2264_v26, %v1961_v19 }
 0x2d2   :  { %v2029_v18 = vsel %vm1201_vm3, %v2028_v47, %v2027_v59  ;;  %v1966_v49 = vrot.slane %v1965_v31, 1  ;;  %v1992_v10 = vadd.f32 %v2264_v26, %v1979_v50  ;;  %v1999_v20 = vmax.f32 %v1991_v40, 0.0 }
 0x2d3   :  { %v1997_v44 = vmax.f32 %v1989_v17, 0.0  ;;  %v2031_v9 = vsel %vm1204_vm4, %v2030_v16, %v2029_v18 }
 0x2d4   :  { %v1967_v12 = vmax.f32 %v1965_v31, %v1966_v49  ;;  %v2000_v21 = vmax.f32 %v1992_v10, 0.0  ;;  %v2036_v30 = vrot.slane %v1999_v20, 2 }
 0x2d5   :  { %v2032_v55 = vrot.slane %v1997_v44, 4 }
 0x2d6   :  { %v1990_v11 = vadd.f32 %v2264_v26, %v1967_v12  ;;  %v2038_v22 = vrot.slane %v2000_v21, 1 }
 0x2d7   :  { %v2033_v62 = vsel %vm1207_vm6, %v2032_v55, %v2031_v9 }
 0x2d8   :  { %v1998_v56 = vmax.f32 %v1990_v11, 0.0 }
 0x2da   :  { %v2034_v27 = vrot.slane %v1998_v56, 3 }
 0x2dc   :  { %v2035_v32 = vsel %vm1210_vm7, %v2034_v27, %v2033_v62 }
 0x2dd   :  { %v2037_v23 = vsel %vm1213_vm8, %v2036_v30, %v2035_v32 }
 0x2de   :  { %v2039_v33 = vsel %vm1216_vm9, %v2038_v22, %v2037_v23 }
 0x2df   :  { %2692 = vmatmul.mubr.f32.vlgmr.msra.gmra.mrb[26].mxu1 %v2039_v33 }
 0x3b2   :  { %v2107_v38 = vpop.f32.mrb[26].mxu1 }
 0x3b3   :  { %v2111_v26 = vadd.f32 %v2107_v38, %v3402_v46  ;;  %v2693_v24 = vpop.f32.mrb[27].mxu1 }
 0x3b5   :  { %v2119_v25 = vadd.f32 %v2265_v29, %v2111_v26 }
 0x3b7   :  { %2120 = vst [vmem:[#allocation11] sm:$0xff] %v2119_v25 }
 0x3b8   :  { %3008 = shalt.err (!%p3005_p2)
}
 0x3b9   :  { %s3009_s21 = scalar_lea.hbm %s3446_s5, 128 }
 0x3ba   :  { %p3010_p3 = scmp.ne.s32.totalorder %s3446_s5, %s3009_s21  ;;  %p3013_p4 = scmp.lt.u32.totalorder %s3009_s21, %s3446_s5 }
 0x3bc   :  { %p3015_p5 = pnand %p3013_p4, %p3010_p3 }
 0x3be   :  { %3018 = shalt.err (!%p3015_p5)
}
 0x3bf   :  { %2130 = dma.vmem_to_hbm [thread:$0]  %s2128_s29, 128, %s3446_s5, [#allocation4]  }
 0x3c0   :  { %3025 = dma.done.wait [#allocation4], 128  }
 0x3c1   :  { %3026 = vsyncadd [#allocation4], 4294967168 }
 0x3c2   :  { %2134 = vsyncpa [#allocation3], 1 }
 0x3c3   :  { %2135 = vsyncpa [#allocation6], 1 }
 0x3c4   :  { %2136 = vsyncpa [#allocation9], 1 }
 0x3c5   :  { %2137 = vsyncpa [#allocation4], 1 }

</bundles_post_ra>
